<compile_context>
chip_gen: v5e
topology: v5e:2x2
jax: 0.10.0
libtpu: 0.0.40
codegen_flags: <defaults>
</compile_context>

<pallas_src>
import functools

import jax
import jax.numpy as jnp
from jax import lax
from jax.experimental import pallas as pl
from jax.experimental.pallas import tpu as pltpu

# ---- model hyper-parameters (fixed by the PyTorch module) ----
F_FEAT = 32              # conv output features
KW = 64                  # conv kernel width
POOL = 8                 # AvgPool2d((1, 8))
STRIP = POOL + KW - 1    # 71: width of one pool-group input strip
NB = POOL * F_FEAT       # 256: banded-conv output lanes (8 in-pool offsets x 32 feats)
HID = 2                  # LSTM hidden size
EPS = 1e-5


def _tile_lanes(v):
    """(1, F) -> (1, POOL*F): repeat along lanes (explicit concat, no cross-lane reshape)."""
    return jnp.concatenate([v] * POOL, axis=1)


def _fold_lanes(v):
    """(R, POOL*F) -> (R, F): sum the POOL lane-groups with VPU adds."""
    out = v[:, 0:F_FEAT]
    for p in range(1, POOL):
        out = out + v[:, p * F_FEAT:(p + 1) * F_FEAT]
    return out


# =========================== fused Pallas kernel ===========================

def _fused_kernel(B, L,
                  xp_ref, wband_ref, cb_ref, gamma_ref, beta_ref,
                  wih_ref, whh_ref, bias_ref,
                  out_ref, xwin_ref):
    """Conv + Batchlayer + ELU + AvgPool + LSTM + LogSoftmax, fully in VMEM.

    xp_ref   : (B, L+63)        replication-padded raw EEG signal
    wband_ref: (STRIP, NB)      banded conv weights (71, 256)
    cb_ref   : (1, NB)          conv bias, tiled over the 8 in-pool offsets
    gamma_ref: (1, F)           Batchlayer gamma
    beta_ref : (1, F)           Batchlayer beta
    wih_ref  : (F, 4H)          LSTM input->hidden, gates concatenated (i|f|g|o)
    whh_ref  : (H, 4H)          LSTM hidden->hidden, gates concatenated
    bias_ref : (1, 4H)          b_ih + b_hh
    out_ref  : (B, H)           log-softmax of h_T
    xwin_ref : (B*S, STRIP)     VMEM scratch: one 71-wide strip per pool group
    """
    S = L // POOL

    # ---- Stage 1: pool-group strips.  For seq step s the B strips are the contiguous
    # block xp[:, s*8 : s*8+71] -> S block stores total, rows land in (s, b) order.
    # TODO(synk): lax.fori_loop(..., unroll=k) at production L.
    for s in range(S):
        xwin_ref[s * B:(s + 1) * B, :] = xp_ref[:, s * POOL:s * POOL + STRIP]

    # ---- Stage 2: banded conv -- ONE lane-dense MXU matmul (B*S, 71) @ (71, 256).
    # Column block p*F..(p+1)*F holds the conv output at in-pool offset p.
    y = jnp.dot(xwin_ref[...], wband_ref[...], preferred_element_type=jnp.float32)
    y = y + cb_ref[...]                                             # (B*S, 256)

    # ---- Stage 3: Batchlayer.  Per-feature stats over batch x time = all rows x the
    # 8 lane groups; two-pass (numerically safe), rsqrt -> EUP slot.
    inv_n = 1.0 / float(B * L)
    mean = _fold_lanes(jnp.sum(y, axis=0, keepdims=True)) * inv_n   # (1, F)
    a = y - _tile_lanes(mean)                                       # single full-size temp
    var = _fold_lanes(jnp.sum(a * a, axis=0, keepdims=True)) * inv_n
    scale = gamma_ref[...] * lax.rsqrt(var + EPS)                   # (1, F)
    z = a * _tile_lanes(scale) + _tile_lanes(beta_ref[...])

    # ---- Stage 4: ELU (alpha=1, overflow-safe form).
    z = jnp.where(z > 0.0, z, jnp.exp(jnp.minimum(z, 0.0)) - 1.0)

    # ---- Stage 5: AvgPool2d((1, 8)) = mean of the 8 lane groups (7 VPU adds).
    pooled = _fold_lanes(z) * (1.0 / POOL)                          # (B*S, F), rows (s, b)

    # ---- Stage 6: LSTM input projection + bias hoisted out of the recurrence.
    xw_all = jnp.dot(pooled, wih_ref[...],
                     preferred_element_type=jnp.float32) + bias_ref[...]   # (S*B, 4H)

    # ---- Stage 7: fully-unrolled recurrence.  HID=2 -> hidden matmul as two VPU
    # broadcast FMAs (no MXU round trip on the serial chain); one sigmoid over the
    # whole gate tensor + one tanh per step.
    whh = whh_ref[...]                                              # (H, 4H), hoisted load
    h = jnp.zeros((B, HID), jnp.float32)
    c = jnp.zeros((B, HID), jnp.float32)
    # TODO(synk): lax.fori_loop(..., unroll=k) at production S.
    for t in range(S):
        gates = (xw_all[t * B:(t + 1) * B, :]
                 + h[:, 0:1] * whh[0:1, :]
                 + h[:, 1:2] * whh[1:2, :])                         # (B, 4H)
        sg = jax.nn.sigmoid(gates)                                  # one EUP pass for i,f,o
        g = jnp.tanh(gates[:, 2 * HID:3 * HID])
        i = sg[:, 0 * HID:1 * HID]
        f = sg[:, 1 * HID:2 * HID]
        o = sg[:, 3 * HID:4 * HID]
        c = f * c + i * g
        h = o * jnp.tanh(c)

    # ---- Stage 8: LogSoftmax(dim=1) of the final hidden state.
    m = jnp.max(h, axis=1, keepdims=True)
    zc = h - m
    lse = jnp.log(jnp.sum(jnp.exp(zc), axis=1, keepdims=True))
    out_ref[...] = zc - lse


# ================================ JAX wrapper ==================================

def _banded_conv_weight(conv_w):
    """(F, KW) conv weight -> (STRIP, POOL*F) banded weight.

    wband[j, p*F + f] = conv_w[f, j - p]  for 0 <= j - p < KW, else 0.
    """
    wT = conv_w.T.astype(jnp.float32)                               # (KW, F)
    wband = jnp.zeros((STRIP, NB), jnp.float32)
    for p in range(POOL):
        wband = wband.at[p:p + KW, p * F_FEAT:(p + 1) * F_FEAT].set(wT)
    return wband


@jax.jit
def cnnlstm_forward(x, conv_w, conv_b, gamma, beta, w_ih, w_hh, b_ih, b_hh):
    """x: (B, 1, L, 1) float32 (PyTorch NCHW convention). Returns (B, 2) log-probs."""
    B = x.shape[0]
    L = x.shape[2]
    assert L % POOL == 0, "time length must be a multiple of the pool width (8)"
    S = L // POOL

    # source.permute(0,1,3,2) + ReplicationPad2d((31,32,0,0)) -> padded (B, L+63)
    signal = x[:, 0, :, 0]
    xp = jnp.pad(signal, ((0, 0), (31, 32)), mode="edge").astype(jnp.float32)

    wband = _banded_conv_weight(conv_w)                              # (71, 256)
    cb_t = jnp.concatenate([conv_b.reshape(1, F_FEAT).astype(jnp.float32)] * POOL,
                           axis=1)                                   # (1, 256)
    g_row = gamma.reshape(1, F_FEAT).astype(jnp.float32)
    be_row = beta.reshape(1, F_FEAT).astype(jnp.float32)
    wih_cat = w_ih.T.astype(jnp.float32)                             # (F, 4H), (i|f|g|o)
    whh_cat = w_hh.T.astype(jnp.float32)                             # (H, 4H)
    bias = (b_ih + b_hh).reshape(1, 4 * HID).astype(jnp.float32)

    vm = pl.BlockSpec(memory_space=pltpu.MemorySpace.VMEM)
    kernel = functools.partial(_fused_kernel, B, L)

    # Explicit VMEM budget (v5e default scoped limit is only 16 MiB).
    rows = B * S
    est = 4 * (rows * 128              # xwin scratch (padded to 128 lanes)
               + 4 * rows * NB         # y / a / z temps + headroom
               + (STRIP + 8) * NB      # banded weight
               + B * (L + 128))        # padded input + small operands
    vmem_limit = int(min(max(2 * est, 8 << 20), 100 << 20))

    out = pl.pallas_call(
        kernel,
        out_shape=jax.ShapeDtypeStruct((B, HID), jnp.float32),
        in_specs=[vm] * 8,
        out_specs=vm,
        scratch_shapes=[pltpu.VMEM((rows, STRIP), jnp.float32)],     # pool-group strips
        compiler_params=pltpu.CompilerParams(vmem_limit_bytes=vmem_limit),
    )(xp, wband, cb_t, g_row, be_row, wih_cat, whh_cat, bias)
    return out


# ============================ pure-JAX reference ===============================

def reference_forward(x, conv_w, conv_b, gamma, beta, w_ih, w_hh, b_ih, b_hh):
    HI = lax.Precision.HIGHEST
    B, _, L, _ = x.shape
    S = L // POOL
    signal = x[:, 0, :, 0]
    xp = jnp.pad(signal, ((0, 0), (31, 32)), mode="edge")
    idx = jnp.arange(L)[:, None] + jnp.arange(KW)[None, :]
    win = xp[:, idx]                                                 # (B, L, KW)
    y = jnp.einsum("blk,fk->blf", win, conv_w, precision=HI) + conv_b
    mean = jnp.mean(y, axis=(0, 1), keepdims=True)
    a = y - mean
    var = jnp.mean(a * a, axis=(0, 1), keepdims=True)
    z = a / jnp.sqrt(var + EPS) * gamma + beta
    z = jnp.where(z > 0.0, z, jnp.exp(z) - 1.0)
    pooled = jnp.mean(z.reshape(B, S, POOL, F_FEAT), axis=2)         # (B, S, F)
    seq = jnp.transpose(pooled, (1, 0, 2))                           # (S, B, F)

    def step(carry, x_t):
        h, c = carry
        gates = (jnp.dot(x_t, w_ih.T, precision=HI)
                 + jnp.dot(h, w_hh.T, precision=HI) + b_ih + b_hh)
        i = jax.nn.sigmoid(gates[:, 0 * HID:1 * HID])
        f = jax.nn.sigmoid(gates[:, 1 * HID:2 * HID])
        g = jnp.tanh(gates[:, 2 * HID:3 * HID])
        o = jax.nn.sigmoid(gates[:, 3 * HID:4 * HID])
        c = f * c + i * g
        h = o * jnp.tanh(c)
        return (h, c), None

    h0 = jnp.zeros((B, HID), jnp.float32)
    (h, _), _ = lax.scan(step, (h0, h0), seq)
    return jax.nn.log_softmax(h, axis=1)


# =================================== main ======================================

if __name__ == "__main__":
    B, L = 2, 64  # input: (batch=2, 1 channel, 64 time samples, 1 EEG channel)

    key = jax.random.PRNGKey(0)
    kx, k1, k2, k3, k4, k5, k6, k7, k8 = jax.random.split(key, 9)

    x = jax.random.normal(kx, (B, 1, L, 1), dtype=jnp.float32)

    # deterministic synthetic parameters (shapes match the PyTorch module)
    conv_w = jax.random.uniform(k1, (F_FEAT, KW), minval=-0.1, maxval=0.1)   # Conv2d(1,32,(1,64)).weight squeezed
    conv_b = jax.random.uniform(k2, (F_FEAT,), minval=-0.1, maxval=0.1)
    gamma = jax.random.uniform(k3, (F_FEAT,), minval=-0.1, maxval=0.1)       # Batchlayer.gamma
    beta = jax.random.uniform(k4, (F_FEAT,), minval=-0.1, maxval=0.1)        # Batchlayer.beta
    # nn.LSTM(32, 2) parameters, PyTorch layout, gate order (i, f, g, o)
    w_ih = jax.random.uniform(k5, (4 * HID, F_FEAT), minval=-0.5, maxval=0.5)
    w_hh = jax.random.uniform(k6, (4 * HID, HID), minval=-0.5, maxval=0.5)
    b_ih = jax.random.uniform(k7, (4 * HID,), minval=-0.5, maxval=0.5)
    b_hh = jax.random.uniform(k8, (4 * HID,), minval=-0.5, maxval=0.5)

    out = cnnlstm_forward(x, conv_w, conv_b, gamma, beta, w_ih, w_hh, b_ih, b_hh)
    out = jax.block_until_ready(out)

    ref = reference_forward(x, conv_w, conv_b, gamma, beta, w_ih, w_hh, b_ih, b_hh)
    assert out.shape == (B, HID), out.shape
    assert bool(jnp.all(jnp.isfinite(out)))
    max_err = float(jnp.max(jnp.abs(out - ref)))
    # f32 end-to-end; structural bugs (banded weight, gate order, BN axes, pooling)
    # would be >> 1e-2.
    assert max_err < 1e-4, f"mismatch vs reference: {max_err}"

    print("KERNEL_OK")
</pallas_src>

<mosaic_0001>
module attributes {stable_mosaic.version = 11 : i64} {
  func.func @_fused_kernel(%arg0: memref<2x127xf32, #tpu.memory_space<vmem>>, %arg1: memref<71x256xf32, #tpu.memory_space<vmem>>, %arg2: memref<1x256xf32, #tpu.memory_space<vmem>>, %arg3: memref<1x32xf32, #tpu.memory_space<vmem>>, %arg4: memref<1x32xf32, #tpu.memory_space<vmem>>, %arg5: memref<32x8xf32, #tpu.memory_space<vmem>>, %arg6: memref<2x8xf32, #tpu.memory_space<vmem>>, %arg7: memref<1x8xf32, #tpu.memory_space<vmem>>, %arg8: memref<2x2xf32, #tpu.memory_space<vmem>>, %arg9: memref<16x71xf32, #tpu.memory_space<vmem>>) attributes {dimension_semantics = [], scalar_prefetch = 0 : i64, scratch_operands = 1 : i64, tpu.core_type = #tpu.core_type<tc>} {
    %c0 = arith.constant 0 : index
    %c0_0 = arith.constant 0 : index
    %0 = vector.load %arg0[%c0, %c0_0] : memref<2x127xf32, #tpu.memory_space<vmem>>, vector<2x71xf32>
    %c0_1 = arith.constant 0 : index
    %c0_2 = arith.constant 0 : index
    %1 = vector.load %arg9[%c0_1, %c0_2] : memref<16x71xf32, #tpu.memory_space<vmem>>, vector<2x71xf32>
    tpu.vector_store %arg9[%c0_1, %c0_2], %0 {strides = array<i32>} : memref<16x71xf32, #tpu.memory_space<vmem>>, vector<2x71xf32>,
    %c0_3 = arith.constant 0 : index
    %c8 = arith.constant 8 : index
    %2 = vector.load %arg0[%c0_3, %c8] : memref<2x127xf32, #tpu.memory_space<vmem>>, vector<2x71xf32>
    %c2 = arith.constant 2 : index
    %c0_4 = arith.constant 0 : index
    %3 = vector.load %arg9[%c2, %c0_4] : memref<16x71xf32, #tpu.memory_space<vmem>>, vector<2x71xf32>
    tpu.vector_store %arg9[%c2, %c0_4], %2 {strides = array<i32>} : memref<16x71xf32, #tpu.memory_space<vmem>>, vector<2x71xf32>,
    %c0_5 = arith.constant 0 : index
    %c16 = arith.constant 16 : index
    %4 = vector.load %arg0[%c0_5, %c16] : memref<2x127xf32, #tpu.memory_space<vmem>>, vector<2x71xf32>
    %c4 = arith.constant 4 : index
    %c0_6 = arith.constant 0 : index
    %5 = vector.load %arg9[%c4, %c0_6] : memref<16x71xf32, #tpu.memory_space<vmem>>, vector<2x71xf32>
    tpu.vector_store %arg9[%c4, %c0_6], %4 {strides = array<i32>} : memref<16x71xf32, #tpu.memory_space<vmem>>, vector<2x71xf32>,
    %c0_7 = arith.constant 0 : index
    %c24 = arith.constant 24 : index
    %6 = vector.load %arg0[%c0_7, %c24] : memref<2x127xf32, #tpu.memory_space<vmem>>, vector<2x71xf32>
    %c6 = arith.constant 6 : index
    %c0_8 = arith.constant 0 : index
    %7 = vector.load %arg9[%c6, %c0_8] : memref<16x71xf32, #tpu.memory_space<vmem>>, vector<2x71xf32>
    tpu.vector_store %arg9[%c6, %c0_8], %6 {strides = array<i32>} : memref<16x71xf32, #tpu.memory_space<vmem>>, vector<2x71xf32>,
    %c0_9 = arith.constant 0 : index
    %c32 = arith.constant 32 : index
    %8 = vector.load %arg0[%c0_9, %c32] : memref<2x127xf32, #tpu.memory_space<vmem>>, vector<2x71xf32>
    %c8_10 = arith.constant 8 : index
    %c0_11 = arith.constant 0 : index
    %9 = vector.load %arg9[%c8_10, %c0_11] : memref<16x71xf32, #tpu.memory_space<vmem>>, vector<2x71xf32>
    tpu.vector_store %arg9[%c8_10, %c0_11], %8 {strides = array<i32>} : memref<16x71xf32, #tpu.memory_space<vmem>>, vector<2x71xf32>,
    %c0_12 = arith.constant 0 : index
    %c40 = arith.constant 40 : index
    %10 = vector.load %arg0[%c0_12, %c40] : memref<2x127xf32, #tpu.memory_space<vmem>>, vector<2x71xf32>
    %c10 = arith.constant 10 : index
    %c0_13 = arith.constant 0 : index
    %11 = vector.load %arg9[%c10, %c0_13] : memref<16x71xf32, #tpu.memory_space<vmem>>, vector<2x71xf32>
    tpu.vector_store %arg9[%c10, %c0_13], %10 {strides = array<i32>} : memref<16x71xf32, #tpu.memory_space<vmem>>, vector<2x71xf32>,
    %c0_14 = arith.constant 0 : index
    %c48 = arith.constant 48 : index
    %12 = vector.load %arg0[%c0_14, %c48] : memref<2x127xf32, #tpu.memory_space<vmem>>, vector<2x71xf32>
    %c12 = arith.constant 12 : index
    %c0_15 = arith.constant 0 : index
    %13 = vector.load %arg9[%c12, %c0_15] : memref<16x71xf32, #tpu.memory_space<vmem>>, vector<2x71xf32>
    tpu.vector_store %arg9[%c12, %c0_15], %12 {strides = array<i32>} : memref<16x71xf32, #tpu.memory_space<vmem>>, vector<2x71xf32>,
    %c0_16 = arith.constant 0 : index
    %c56 = arith.constant 56 : index
    %14 = vector.load %arg0[%c0_16, %c56] : memref<2x127xf32, #tpu.memory_space<vmem>>, vector<2x71xf32>
    %c14 = arith.constant 14 : index
    %c0_17 = arith.constant 0 : index
    %15 = vector.load %arg9[%c14, %c0_17] : memref<16x71xf32, #tpu.memory_space<vmem>>, vector<2x71xf32>
    tpu.vector_store %arg9[%c14, %c0_17], %14 {strides = array<i32>} : memref<16x71xf32, #tpu.memory_space<vmem>>, vector<2x71xf32>,
    %c0_18 = arith.constant 0 : index
    %c0_19 = arith.constant 0 : index
    %16 = vector.load %arg9[%c0_18, %c0_19] : memref<16x71xf32, #tpu.memory_space<vmem>>, vector<16x71xf32>
    %c0_20 = arith.constant 0 : index
    %c0_21 = arith.constant 0 : index
    %17 = vector.load %arg1[%c0_20, %c0_21] : memref<71x256xf32, #tpu.memory_space<vmem>>, vector<71x256xf32>
    %cst = arith.constant dense<0.000000e+00> : vector<16x256xf32>
    %18 = tpu.matmul %16, %17, %cst {dimension_numbers = #tpu.dot_dimension_numbers<[1], [0], [0], [1], [0, 0, 1, 1], [], []>} : vector<16x71xf32>, vector<71x256xf32>, vector<16x256xf32> -> vector<16x256xf32>
    %c0_22 = arith.constant 0 : index
    %c0_23 = arith.constant 0 : index
    %19 = vector.load %arg2[%c0_22, %c0_23] : memref<1x256xf32, #tpu.memory_space<vmem>>, vector<1x256xf32>
    %20 = vector.broadcast %19 : vector<1x256xf32> to vector<16x256xf32>
    %21 = arith.addf %18, %20 : vector<16x256xf32>
    %cst_24 = arith.constant dense<0.000000e+00> : vector<256xf32>
    %22 = vector.multi_reduction <add>, %21, %cst_24 [0] : vector<16x256xf32> to vector<256xf32>
    %23 = vector.shape_cast %22 : vector<256xf32> to vector<1x256xf32>
    %24 = vector.extract_strided_slice %23 {offsets = [0, 0], sizes = [1, 32], strides = [1, 1]} : vector<1x256xf32> to vector<1x32xf32>
    %25 = vector.extract_strided_slice %23 {offsets = [0, 32], sizes = [1, 32], strides = [1, 1]} : vector<1x256xf32> to vector<1x32xf32>
    %26 = arith.addf %24, %25 : vector<1x32xf32>
    %27 = vector.extract_strided_slice %23 {offsets = [0, 64], sizes = [1, 32], strides = [1, 1]} : vector<1x256xf32> to vector<1x32xf32>
    %28 = arith.addf %26, %27 : vector<1x32xf32>
    %29 = vector.extract_strided_slice %23 {offsets = [0, 96], sizes = [1, 32], strides = [1, 1]} : vector<1x256xf32> to vector<1x32xf32>
    %30 = arith.addf %28, %29 : vector<1x32xf32>
    %31 = vector.extract_strided_slice %23 {offsets = [0, 128], sizes = [1, 32], strides = [1, 1]} : vector<1x256xf32> to vector<1x32xf32>
    %32 = arith.addf %30, %31 : vector<1x32xf32>
    %33 = vector.extract_strided_slice %23 {offsets = [0, 160], sizes = [1, 32], strides = [1, 1]} : vector<1x256xf32> to vector<1x32xf32>
    %34 = arith.addf %32, %33 : vector<1x32xf32>
    %35 = vector.extract_strided_slice %23 {offsets = [0, 192], sizes = [1, 32], strides = [1, 1]} : vector<1x256xf32> to vector<1x32xf32>
    %36 = arith.addf %34, %35 : vector<1x32xf32>
    %37 = vector.extract_strided_slice %23 {offsets = [0, 224], sizes = [1, 32], strides = [1, 1]} : vector<1x256xf32> to vector<1x32xf32>
    %38 = arith.addf %36, %37 : vector<1x32xf32>
    %cst_25 = arith.constant 7.812500e-03 : f32
    %39 = vector.broadcast %cst_25 : f32 to vector<1x32xf32>
    %40 = arith.mulf %38, %39 : vector<1x32xf32>
    %41 = tpu.concatenate %40, %40, %40, %40, %40, %40, %40, %40 in 1 : vector<1x32xf32>, vector<1x32xf32>, vector<1x32xf32>, vector<1x32xf32>, vector<1x32xf32>, vector<1x32xf32>, vector<1x32xf32>, vector<1x32xf32> -> vector<1x256xf32>
    %42 = vector.broadcast %41 : vector<1x256xf32> to vector<16x256xf32>
    %43 = arith.subf %21, %42 : vector<16x256xf32>
    %44 = arith.mulf %43, %43 : vector<16x256xf32>
    %cst_26 = arith.constant dense<0.000000e+00> : vector<256xf32>
    %45 = vector.multi_reduction <add>, %44, %cst_26 [0] : vector<16x256xf32> to vector<256xf32>
    %46 = vector.shape_cast %45 : vector<256xf32> to vector<1x256xf32>
    %47 = vector.extract_strided_slice %46 {offsets = [0, 0], sizes = [1, 32], strides = [1, 1]} : vector<1x256xf32> to vector<1x32xf32>
    %48 = vector.extract_strided_slice %46 {offsets = [0, 32], sizes = [1, 32], strides = [1, 1]} : vector<1x256xf32> to vector<1x32xf32>
    %49 = arith.addf %47, %48 : vector<1x32xf32>
    %50 = vector.extract_strided_slice %46 {offsets = [0, 64], sizes = [1, 32], strides = [1, 1]} : vector<1x256xf32> to vector<1x32xf32>
    %51 = arith.addf %49, %50 : vector<1x32xf32>
    %52 = vector.extract_strided_slice %46 {offsets = [0, 96], sizes = [1, 32], strides = [1, 1]} : vector<1x256xf32> to vector<1x32xf32>
    %53 = arith.addf %51, %52 : vector<1x32xf32>
    %54 = vector.extract_strided_slice %46 {offsets = [0, 128], sizes = [1, 32], strides = [1, 1]} : vector<1x256xf32> to vector<1x32xf32>
    %55 = arith.addf %53, %54 : vector<1x32xf32>
    %56 = vector.extract_strided_slice %46 {offsets = [0, 160], sizes = [1, 32], strides = [1, 1]} : vector<1x256xf32> to vector<1x32xf32>
    %57 = arith.addf %55, %56 : vector<1x32xf32>
    %58 = vector.extract_strided_slice %46 {offsets = [0, 192], sizes = [1, 32], strides = [1, 1]} : vector<1x256xf32> to vector<1x32xf32>
    %59 = arith.addf %57, %58 : vector<1x32xf32>
    %60 = vector.extract_strided_slice %46 {offsets = [0, 224], sizes = [1, 32], strides = [1, 1]} : vector<1x256xf32> to vector<1x32xf32>
    %61 = arith.addf %59, %60 : vector<1x32xf32>
    %cst_27 = arith.constant 7.812500e-03 : f32
    %62 = vector.broadcast %cst_27 : f32 to vector<1x32xf32>
    %63 = arith.mulf %61, %62 : vector<1x32xf32>
    %c0_28 = arith.constant 0 : index
    %c0_29 = arith.constant 0 : index
    %64 = vector.load %arg3[%c0_28, %c0_29] : memref<1x32xf32, #tpu.memory_space<vmem>>, vector<1x32xf32>
    %cst_30 = arith.constant 9.99999974E-6 : f32
    %65 = vector.broadcast %cst_30 : f32 to vector<1x32xf32>
    %66 = arith.addf %63, %65 : vector<1x32xf32>
    %67 = math.rsqrt %66 : vector<1x32xf32>
    %68 = arith.mulf %64, %67 : vector<1x32xf32>
    %69 = tpu.concatenate %68, %68, %68, %68, %68, %68, %68, %68 in 1 : vector<1x32xf32>, vector<1x32xf32>, vector<1x32xf32>, vector<1x32xf32>, vector<1x32xf32>, vector<1x32xf32>, vector<1x32xf32>, vector<1x32xf32> -> vector<1x256xf32>
    %70 = vector.broadcast %69 : vector<1x256xf32> to vector<16x256xf32>
    %71 = arith.mulf %43, %70 : vector<16x256xf32>
    %c0_31 = arith.constant 0 : index
    %c0_32 = arith.constant 0 : index
    %72 = vector.load %arg4[%c0_31, %c0_32] : memref<1x32xf32, #tpu.memory_space<vmem>>, vector<1x32xf32>
    %73 = tpu.concatenate %72, %72, %72, %72, %72, %72, %72, %72 in 1 : vector<1x32xf32>, vector<1x32xf32>, vector<1x32xf32>, vector<1x32xf32>, vector<1x32xf32>, vector<1x32xf32>, vector<1x32xf32>, vector<1x32xf32> -> vector<1x256xf32>
    %74 = vector.broadcast %73 : vector<1x256xf32> to vector<16x256xf32>
    %75 = arith.addf %71, %74 : vector<16x256xf32>
    %cst_33 = arith.constant 0.000000e+00 : f32
    %76 = vector.broadcast %cst_33 : f32 to vector<16x256xf32>
    %77 = arith.cmpf ogt, %75, %76 : vector<16x256xf32>
    %cst_34 = arith.constant 0.000000e+00 : f32
    %78 = vector.broadcast %cst_34 : f32 to vector<16x256xf32>
    %79 = arith.minimumf %75, %78 : vector<16x256xf32>
    %80 = math.exp %79 : vector<16x256xf32>
    %cst_35 = arith.constant 1.000000e+00 : f32
    %81 = vector.broadcast %cst_35 : f32 to vector<16x256xf32>
    %82 = arith.subf %80, %81 : vector<16x256xf32>
    %83 = arith.select %77, %75, %82 : vector<16x256xi1>, vector<16x256xf32>
    %84 = vector.extract_strided_slice %83 {offsets = [0, 0], sizes = [16, 32], strides = [1, 1]} : vector<16x256xf32> to vector<16x32xf32>
    %85 = vector.extract_strided_slice %83 {offsets = [0, 32], sizes = [16, 32], strides = [1, 1]} : vector<16x256xf32> to vector<16x32xf32>
    %86 = arith.addf %84, %85 : vector<16x32xf32>
    %87 = vector.extract_strided_slice %83 {offsets = [0, 64], sizes = [16, 32], strides = [1, 1]} : vector<16x256xf32> to vector<16x32xf32>
    %88 = arith.addf %86, %87 : vector<16x32xf32>
    %89 = vector.extract_strided_slice %83 {offsets = [0, 96], sizes = [16, 32], strides = [1, 1]} : vector<16x256xf32> to vector<16x32xf32>
    %90 = arith.addf %88, %89 : vector<16x32xf32>
    %91 = vector.extract_strided_slice %83 {offsets = [0, 128], sizes = [16, 32], strides = [1, 1]} : vector<16x256xf32> to vector<16x32xf32>
    %92 = arith.addf %90, %91 : vector<16x32xf32>
    %93 = vector.extract_strided_slice %83 {offsets = [0, 160], sizes = [16, 32], strides = [1, 1]} : vector<16x256xf32> to vector<16x32xf32>
    %94 = arith.addf %92, %93 : vector<16x32xf32>
    %95 = vector.extract_strided_slice %83 {offsets = [0, 192], sizes = [16, 32], strides = [1, 1]} : vector<16x256xf32> to vector<16x32xf32>
    %96 = arith.addf %94, %95 : vector<16x32xf32>
    %97 = vector.extract_strided_slice %83 {offsets = [0, 224], sizes = [16, 32], strides = [1, 1]} : vector<16x256xf32> to vector<16x32xf32>
    %98 = arith.addf %96, %97 : vector<16x32xf32>
    %cst_36 = arith.constant 1.250000e-01 : f32
    %99 = vector.broadcast %cst_36 : f32 to vector<16x32xf32>
    %100 = arith.mulf %98, %99 : vector<16x32xf32>
    %c0_37 = arith.constant 0 : index
    %c0_38 = arith.constant 0 : index
    %101 = vector.load %arg5[%c0_37, %c0_38] : memref<32x8xf32, #tpu.memory_space<vmem>>, vector<32x8xf32>
    %cst_39 = arith.constant dense<0.000000e+00> : vector<16x8xf32>
    %102 = tpu.matmul %100, %101, %cst_39 {dimension_numbers = #tpu.dot_dimension_numbers<[1], [0], [0], [1], [0, 0, 1, 1], [], []>} : vector<16x32xf32>, vector<32x8xf32>, vector<16x8xf32> -> vector<16x8xf32>
    %c0_40 = arith.constant 0 : index
    %c0_41 = arith.constant 0 : index
    %103 = vector.load %arg7[%c0_40, %c0_41] : memref<1x8xf32, #tpu.memory_space<vmem>>, vector<1x8xf32>
    %104 = vector.broadcast %103 : vector<1x8xf32> to vector<16x8xf32>
    %105 = arith.addf %102, %104 : vector<16x8xf32>
    %c0_42 = arith.constant 0 : index
    %c0_43 = arith.constant 0 : index
    %106 = vector.load %arg6[%c0_42, %c0_43] : memref<2x8xf32, #tpu.memory_space<vmem>>, vector<2x8xf32>
    %cst_44 = arith.constant 0.000000e+00 : f32
    %107 = vector.broadcast %cst_44 : f32 to vector<2x2xf32>
    %cst_45 = arith.constant 0.000000e+00 : f32
    %108 = vector.broadcast %cst_45 : f32 to vector<2x2xf32>
    %109 = vector.extract_strided_slice %105 {offsets = [0, 0], sizes = [2, 8], strides = [1, 1]} : vector<16x8xf32> to vector<2x8xf32>
    %110 = vector.extract_strided_slice %107 {offsets = [0, 0], sizes = [2, 1], strides = [1, 1]} : vector<2x2xf32> to vector<2x1xf32>
    %111 = vector.extract_strided_slice %106 {offsets = [0, 0], sizes = [1, 8], strides = [1, 1]} : vector<2x8xf32> to vector<1x8xf32>
    %112 = vector.broadcast %110 : vector<2x1xf32> to vector<2x8xf32>
    %113 = vector.broadcast %111 : vector<1x8xf32> to vector<2x8xf32>
    %114 = arith.mulf %112, %113 : vector<2x8xf32>
    %115 = arith.addf %109, %114 : vector<2x8xf32>
    %116 = vector.extract_strided_slice %107 {offsets = [0, 1], sizes = [2, 1], strides = [1, 1]} : vector<2x2xf32> to vector<2x1xf32>
    %117 = vector.extract_strided_slice %106 {offsets = [1, 0], sizes = [1, 8], strides = [1, 1]} : vector<2x8xf32> to vector<1x8xf32>
    %118 = vector.broadcast %116 : vector<2x1xf32> to vector<2x8xf32>
    %119 = vector.broadcast %117 : vector<1x8xf32> to vector<2x8xf32>
    %120 = arith.mulf %118, %119 : vector<2x8xf32>
    %121 = arith.addf %115, %120 : vector<2x8xf32>
    %122 = arith.negf %121 : vector<2x8xf32>
    %123 = math.exp %122 : vector<2x8xf32>
    %cst_46 = arith.constant 1.000000e+00 : f32
    %124 = vector.broadcast %cst_46 : f32 to vector<2x8xf32>
    %125 = arith.addf %124, %123 : vector<2x8xf32>
    %126 = arith.divf %124, %125 : vector<2x8xf32>
    %127 = vector.extract_strided_slice %121 {offsets = [0, 4], sizes = [2, 2], strides = [1, 1]} : vector<2x8xf32> to vector<2x2xf32>
    %128 = math.tanh %127 : vector<2x2xf32>
    %129 = vector.extract_strided_slice %126 {offsets = [0, 0], sizes = [2, 2], strides = [1, 1]} : vector<2x8xf32> to vector<2x2xf32>
    %130 = vector.extract_strided_slice %126 {offsets = [0, 2], sizes = [2, 2], strides = [1, 1]} : vector<2x8xf32> to vector<2x2xf32>
    %131 = vector.extract_strided_slice %126 {offsets = [0, 6], sizes = [2, 2], strides = [1, 1]} : vector<2x8xf32> to vector<2x2xf32>
    %132 = arith.mulf %130, %108 : vector<2x2xf32>
    %133 = arith.mulf %129, %128 : vector<2x2xf32>
    %134 = arith.addf %132, %133 : vector<2x2xf32>
    %135 = math.tanh %134 : vector<2x2xf32>
    %136 = arith.mulf %131, %135 : vector<2x2xf32>
    %137 = vector.extract_strided_slice %105 {offsets = [2, 0], sizes = [2, 8], strides = [1, 1]} : vector<16x8xf32> to vector<2x8xf32>
    %138 = vector.extract_strided_slice %136 {offsets = [0, 0], sizes = [2, 1], strides = [1, 1]} : vector<2x2xf32> to vector<2x1xf32>
    %139 = vector.extract_strided_slice %106 {offsets = [0, 0], sizes = [1, 8], strides = [1, 1]} : vector<2x8xf32> to vector<1x8xf32>
    %140 = vector.broadcast %138 : vector<2x1xf32> to vector<2x8xf32>
    %141 = vector.broadcast %139 : vector<1x8xf32> to vector<2x8xf32>
    %142 = arith.mulf %140, %141 : vector<2x8xf32>
    %143 = arith.addf %137, %142 : vector<2x8xf32>
    %144 = vector.extract_strided_slice %136 {offsets = [0, 1], sizes = [2, 1], strides = [1, 1]} : vector<2x2xf32> to vector<2x1xf32>
    %145 = vector.extract_strided_slice %106 {offsets = [1, 0], sizes = [1, 8], strides = [1, 1]} : vector<2x8xf32> to vector<1x8xf32>
    %146 = vector.broadcast %144 : vector<2x1xf32> to vector<2x8xf32>
    %147 = vector.broadcast %145 : vector<1x8xf32> to vector<2x8xf32>
    %148 = arith.mulf %146, %147 : vector<2x8xf32>
    %149 = arith.addf %143, %148 : vector<2x8xf32>
    %150 = arith.negf %149 : vector<2x8xf32>
    %151 = math.exp %150 : vector<2x8xf32>
    %cst_47 = arith.constant 1.000000e+00 : f32
    %152 = vector.broadcast %cst_47 : f32 to vector<2x8xf32>
    %153 = arith.addf %152, %151 : vector<2x8xf32>
    %154 = arith.divf %152, %153 : vector<2x8xf32>
    %155 = vector.extract_strided_slice %149 {offsets = [0, 4], sizes = [2, 2], strides = [1, 1]} : vector<2x8xf32> to vector<2x2xf32>
    %156 = math.tanh %155 : vector<2x2xf32>
    %157 = vector.extract_strided_slice %154 {offsets = [0, 0], sizes = [2, 2], strides = [1, 1]} : vector<2x8xf32> to vector<2x2xf32>
    %158 = vector.extract_strided_slice %154 {offsets = [0, 2], sizes = [2, 2], strides = [1, 1]} : vector<2x8xf32> to vector<2x2xf32>
    %159 = vector.extract_strided_slice %154 {offsets = [0, 6], sizes = [2, 2], strides = [1, 1]} : vector<2x8xf32> to vector<2x2xf32>
    %160 = arith.mulf %158, %134 : vector<2x2xf32>
    %161 = arith.mulf %157, %156 : vector<2x2xf32>
    %162 = arith.addf %160, %161 : vector<2x2xf32>
    %163 = math.tanh %162 : vector<2x2xf32>
    %164 = arith.mulf %159, %163 : vector<2x2xf32>
    %165 = vector.extract_strided_slice %105 {offsets = [4, 0], sizes = [2, 8], strides = [1, 1]} : vector<16x8xf32> to vector<2x8xf32>
    %166 = vector.extract_strided_slice %164 {offsets = [0, 0], sizes = [2, 1], strides = [1, 1]} : vector<2x2xf32> to vector<2x1xf32>
    %167 = vector.extract_strided_slice %106 {offsets = [0, 0], sizes = [1, 8], strides = [1, 1]} : vector<2x8xf32> to vector<1x8xf32>
    %168 = vector.broadcast %166 : vector<2x1xf32> to vector<2x8xf32>
    %169 = vector.broadcast %167 : vector<1x8xf32> to vector<2x8xf32>
    %170 = arith.mulf %168, %169 : vector<2x8xf32>
    %171 = arith.addf %165, %170 : vector<2x8xf32>
    %172 = vector.extract_strided_slice %164 {offsets = [0, 1], sizes = [2, 1], strides = [1, 1]} : vector<2x2xf32> to vector<2x1xf32>
    %173 = vector.extract_strided_slice %106 {offsets = [1, 0], sizes = [1, 8], strides = [1, 1]} : vector<2x8xf32> to vector<1x8xf32>
    %174 = vector.broadcast %172 : vector<2x1xf32> to vector<2x8xf32>
    %175 = vector.broadcast %173 : vector<1x8xf32> to vector<2x8xf32>
    %176 = arith.mulf %174, %175 : vector<2x8xf32>
    %177 = arith.addf %171, %176 : vector<2x8xf32>
    %178 = arith.negf %177 : vector<2x8xf32>
    %179 = math.exp %178 : vector<2x8xf32>
    %cst_48 = arith.constant 1.000000e+00 : f32
    %180 = vector.broadcast %cst_48 : f32 to vector<2x8xf32>
    %181 = arith.addf %180, %179 : vector<2x8xf32>
    %182 = arith.divf %180, %181 : vector<2x8xf32>
    %183 = vector.extract_strided_slice %177 {offsets = [0, 4], sizes = [2, 2], strides = [1, 1]} : vector<2x8xf32> to vector<2x2xf32>
    %184 = math.tanh %183 : vector<2x2xf32>
    %185 = vector.extract_strided_slice %182 {offsets = [0, 0], sizes = [2, 2], strides = [1, 1]} : vector<2x8xf32> to vector<2x2xf32>
    %186 = vector.extract_strided_slice %182 {offsets = [0, 2], sizes = [2, 2], strides = [1, 1]} : vector<2x8xf32> to vector<2x2xf32>
    %187 = vector.extract_strided_slice %182 {offsets = [0, 6], sizes = [2, 2], strides = [1, 1]} : vector<2x8xf32> to vector<2x2xf32>
    %188 = arith.mulf %186, %162 : vector<2x2xf32>
    %189 = arith.mulf %185, %184 : vector<2x2xf32>
    %190 = arith.addf %188, %189 : vector<2x2xf32>
    %191 = math.tanh %190 : vector<2x2xf32>
    %192 = arith.mulf %187, %191 : vector<2x2xf32>
    %193 = vector.extract_strided_slice %105 {offsets = [6, 0], sizes = [2, 8], strides = [1, 1]} : vector<16x8xf32> to vector<2x8xf32>
    %194 = vector.extract_strided_slice %192 {offsets = [0, 0], sizes = [2, 1], strides = [1, 1]} : vector<2x2xf32> to vector<2x1xf32>
    %195 = vector.extract_strided_slice %106 {offsets = [0, 0], sizes = [1, 8], strides = [1, 1]} : vector<2x8xf32> to vector<1x8xf32>
    %196 = vector.broadcast %194 : vector<2x1xf32> to vector<2x8xf32>
    %197 = vector.broadcast %195 : vector<1x8xf32> to vector<2x8xf32>
    %198 = arith.mulf %196, %197 : vector<2x8xf32>
    %199 = arith.addf %193, %198 : vector<2x8xf32>
    %200 = vector.extract_strided_slice %192 {offsets = [0, 1], sizes = [2, 1], strides = [1, 1]} : vector<2x2xf32> to vector<2x1xf32>
    %201 = vector.extract_strided_slice %106 {offsets = [1, 0], sizes = [1, 8], strides = [1, 1]} : vector<2x8xf32> to vector<1x8xf32>
    %202 = vector.broadcast %200 : vector<2x1xf32> to vector<2x8xf32>
    %203 = vector.broadcast %201 : vector<1x8xf32> to vector<2x8xf32>
    %204 = arith.mulf %202, %203 : vector<2x8xf32>
    %205 = arith.addf %199, %204 : vector<2x8xf32>
    %206 = arith.negf %205 : vector<2x8xf32>
    %207 = math.exp %206 : vector<2x8xf32>
    %cst_49 = arith.constant 1.000000e+00 : f32
    %208 = vector.broadcast %cst_49 : f32 to vector<2x8xf32>
    %209 = arith.addf %208, %207 : vector<2x8xf32>
    %210 = arith.divf %208, %209 : vector<2x8xf32>
    %211 = vector.extract_strided_slice %205 {offsets = [0, 4], sizes = [2, 2], strides = [1, 1]} : vector<2x8xf32> to vector<2x2xf32>
    %212 = math.tanh %211 : vector<2x2xf32>
    %213 = vector.extract_strided_slice %210 {offsets = [0, 0], sizes = [2, 2], strides = [1, 1]} : vector<2x8xf32> to vector<2x2xf32>
    %214 = vector.extract_strided_slice %210 {offsets = [0, 2], sizes = [2, 2], strides = [1, 1]} : vector<2x8xf32> to vector<2x2xf32>
    %215 = vector.extract_strided_slice %210 {offsets = [0, 6], sizes = [2, 2], strides = [1, 1]} : vector<2x8xf32> to vector<2x2xf32>
    %216 = arith.mulf %214, %190 : vector<2x2xf32>
    %217 = arith.mulf %213, %212 : vector<2x2xf32>
    %218 = arith.addf %216, %217 : vector<2x2xf32>
    %219 = math.tanh %218 : vector<2x2xf32>
    %220 = arith.mulf %215, %219 : vector<2x2xf32>
    %221 = vector.extract_strided_slice %105 {offsets = [8, 0], sizes = [2, 8], strides = [1, 1]} : vector<16x8xf32> to vector<2x8xf32>
    %222 = vector.extract_strided_slice %220 {offsets = [0, 0], sizes = [2, 1], strides = [1, 1]} : vector<2x2xf32> to vector<2x1xf32>
    %223 = vector.extract_strided_slice %106 {offsets = [0, 0], sizes = [1, 8], strides = [1, 1]} : vector<2x8xf32> to vector<1x8xf32>
    %224 = vector.broadcast %222 : vector<2x1xf32> to vector<2x8xf32>
    %225 = vector.broadcast %223 : vector<1x8xf32> to vector<2x8xf32>
    %226 = arith.mulf %224, %225 : vector<2x8xf32>
    %227 = arith.addf %221, %226 : vector<2x8xf32>
    %228 = vector.extract_strided_slice %220 {offsets = [0, 1], sizes = [2, 1], strides = [1, 1]} : vector<2x2xf32> to vector<2x1xf32>
    %229 = vector.extract_strided_slice %106 {offsets = [1, 0], sizes = [1, 8], strides = [1, 1]} : vector<2x8xf32> to vector<1x8xf32>
    %230 = vector.broadcast %228 : vector<2x1xf32> to vector<2x8xf32>
    %231 = vector.broadcast %229 : vector<1x8xf32> to vector<2x8xf32>
    %232 = arith.mulf %230, %231 : vector<2x8xf32>
    %233 = arith.addf %227, %232 : vector<2x8xf32>
    %234 = arith.negf %233 : vector<2x8xf32>
    %235 = math.exp %234 : vector<2x8xf32>
    %cst_50 = arith.constant 1.000000e+00 : f32
    %236 = vector.broadcast %cst_50 : f32 to vector<2x8xf32>
    %237 = arith.addf %236, %235 : vector<2x8xf32>
    %238 = arith.divf %236, %237 : vector<2x8xf32>
    %239 = vector.extract_strided_slice %233 {offsets = [0, 4], sizes = [2, 2], strides = [1, 1]} : vector<2x8xf32> to vector<2x2xf32>
    %240 = math.tanh %239 : vector<2x2xf32>
    %241 = vector.extract_strided_slice %238 {offsets = [0, 0], sizes = [2, 2], strides = [1, 1]} : vector<2x8xf32> to vector<2x2xf32>
    %242 = vector.extract_strided_slice %238 {offsets = [0, 2], sizes = [2, 2], strides = [1, 1]} : vector<2x8xf32> to vector<2x2xf32>
    %243 = vector.extract_strided_slice %238 {offsets = [0, 6], sizes = [2, 2], strides = [1, 1]} : vector<2x8xf32> to vector<2x2xf32>
    %244 = arith.mulf %242, %218 : vector<2x2xf32>
    %245 = arith.mulf %241, %240 : vector<2x2xf32>
    %246 = arith.addf %244, %245 : vector<2x2xf32>
    %247 = math.tanh %246 : vector<2x2xf32>
    %248 = arith.mulf %243, %247 : vector<2x2xf32>
    %249 = vector.extract_strided_slice %105 {offsets = [10, 0], sizes = [2, 8], strides = [1, 1]} : vector<16x8xf32> to vector<2x8xf32>
    %250 = vector.extract_strided_slice %248 {offsets = [0, 0], sizes = [2, 1], strides = [1, 1]} : vector<2x2xf32> to vector<2x1xf32>
    %251 = vector.extract_strided_slice %106 {offsets = [0, 0], sizes = [1, 8], strides = [1, 1]} : vector<2x8xf32> to vector<1x8xf32>
    %252 = vector.broadcast %250 : vector<2x1xf32> to vector<2x8xf32>
    %253 = vector.broadcast %251 : vector<1x8xf32> to vector<2x8xf32>
    %254 = arith.mulf %252, %253 : vector<2x8xf32>
    %255 = arith.addf %249, %254 : vector<2x8xf32>
    %256 = vector.extract_strided_slice %248 {offsets = [0, 1], sizes = [2, 1], strides = [1, 1]} : vector<2x2xf32> to vector<2x1xf32>
    %257 = vector.extract_strided_slice %106 {offsets = [1, 0], sizes = [1, 8], strides = [1, 1]} : vector<2x8xf32> to vector<1x8xf32>
    %258 = vector.broadcast %256 : vector<2x1xf32> to vector<2x8xf32>
    %259 = vector.broadcast %257 : vector<1x8xf32> to vector<2x8xf32>
    %260 = arith.mulf %258, %259 : vector<2x8xf32>
    %261 = arith.addf %255, %260 : vector<2x8xf32>
    %262 = arith.negf %261 : vector<2x8xf32>
    %263 = math.exp %262 : vector<2x8xf32>
    %cst_51 = arith.constant 1.000000e+00 : f32
    %264 = vector.broadcast %cst_51 : f32 to vector<2x8xf32>
    %265 = arith.addf %264, %263 : vector<2x8xf32>
    %266 = arith.divf %264, %265 : vector<2x8xf32>
    %267 = vector.extract_strided_slice %261 {offsets = [0, 4], sizes = [2, 2], strides = [1, 1]} : vector<2x8xf32> to vector<2x2xf32>
    %268 = math.tanh %267 : vector<2x2xf32>
    %269 = vector.extract_strided_slice %266 {offsets = [0, 0], sizes = [2, 2], strides = [1, 1]} : vector<2x8xf32> to vector<2x2xf32>
    %270 = vector.extract_strided_slice %266 {offsets = [0, 2], sizes = [2, 2], strides = [1, 1]} : vector<2x8xf32> to vector<2x2xf32>
    %271 = vector.extract_strided_slice %266 {offsets = [0, 6], sizes = [2, 2], strides = [1, 1]} : vector<2x8xf32> to vector<2x2xf32>
    %272 = arith.mulf %270, %246 : vector<2x2xf32>
    %273 = arith.mulf %269, %268 : vector<2x2xf32>
    %274 = arith.addf %272, %273 : vector<2x2xf32>
    %275 = math.tanh %274 : vector<2x2xf32>
    %276 = arith.mulf %271, %275 : vector<2x2xf32>
    %277 = vector.extract_strided_slice %105 {offsets = [12, 0], sizes = [2, 8], strides = [1, 1]} : vector<16x8xf32> to vector<2x8xf32>
    %278 = vector.extract_strided_slice %276 {offsets = [0, 0], sizes = [2, 1], strides = [1, 1]} : vector<2x2xf32> to vector<2x1xf32>
    %279 = vector.extract_strided_slice %106 {offsets = [0, 0], sizes = [1, 8], strides = [1, 1]} : vector<2x8xf32> to vector<1x8xf32>
    %280 = vector.broadcast %278 : vector<2x1xf32> to vector<2x8xf32>
    %281 = vector.broadcast %279 : vector<1x8xf32> to vector<2x8xf32>
    %282 = arith.mulf %280, %281 : vector<2x8xf32>
    %283 = arith.addf %277, %282 : vector<2x8xf32>
    %284 = vector.extract_strided_slice %276 {offsets = [0, 1], sizes = [2, 1], strides = [1, 1]} : vector<2x2xf32> to vector<2x1xf32>
    %285 = vector.extract_strided_slice %106 {offsets = [1, 0], sizes = [1, 8], strides = [1, 1]} : vector<2x8xf32> to vector<1x8xf32>
    %286 = vector.broadcast %284 : vector<2x1xf32> to vector<2x8xf32>
    %287 = vector.broadcast %285 : vector<1x8xf32> to vector<2x8xf32>
    %288 = arith.mulf %286, %287 : vector<2x8xf32>
    %289 = arith.addf %283, %288 : vector<2x8xf32>
    %290 = arith.negf %289 : vector<2x8xf32>
    %291 = math.exp %290 : vector<2x8xf32>
    %cst_52 = arith.constant 1.000000e+00 : f32
    %292 = vector.broadcast %cst_52 : f32 to vector<2x8xf32>
    %293 = arith.addf %292, %291 : vector<2x8xf32>
    %294 = arith.divf %292, %293 : vector<2x8xf32>
    %295 = vector.extract_strided_slice %289 {offsets = [0, 4], sizes = [2, 2], strides = [1, 1]} : vector<2x8xf32> to vector<2x2xf32>
    %296 = math.tanh %295 : vector<2x2xf32>
    %297 = vector.extract_strided_slice %294 {offsets = [0, 0], sizes = [2, 2], strides = [1, 1]} : vector<2x8xf32> to vector<2x2xf32>
    %298 = vector.extract_strided_slice %294 {offsets = [0, 2], sizes = [2, 2], strides = [1, 1]} : vector<2x8xf32> to vector<2x2xf32>
    %299 = vector.extract_strided_slice %294 {offsets = [0, 6], sizes = [2, 2], strides = [1, 1]} : vector<2x8xf32> to vector<2x2xf32>
    %300 = arith.mulf %298, %274 : vector<2x2xf32>
    %301 = arith.mulf %297, %296 : vector<2x2xf32>
    %302 = arith.addf %300, %301 : vector<2x2xf32>
    %303 = math.tanh %302 : vector<2x2xf32>
    %304 = arith.mulf %299, %303 : vector<2x2xf32>
    %305 = vector.extract_strided_slice %105 {offsets = [14, 0], sizes = [2, 8], strides = [1, 1]} : vector<16x8xf32> to vector<2x8xf32>
    %306 = vector.extract_strided_slice %304 {offsets = [0, 0], sizes = [2, 1], strides = [1, 1]} : vector<2x2xf32> to vector<2x1xf32>
    %307 = vector.extract_strided_slice %106 {offsets = [0, 0], sizes = [1, 8], strides = [1, 1]} : vector<2x8xf32> to vector<1x8xf32>
    %308 = vector.broadcast %306 : vector<2x1xf32> to vector<2x8xf32>
    %309 = vector.broadcast %307 : vector<1x8xf32> to vector<2x8xf32>
    %310 = arith.mulf %308, %309 : vector<2x8xf32>
    %311 = arith.addf %305, %310 : vector<2x8xf32>
    %312 = vector.extract_strided_slice %304 {offsets = [0, 1], sizes = [2, 1], strides = [1, 1]} : vector<2x2xf32> to vector<2x1xf32>
    %313 = vector.extract_strided_slice %106 {offsets = [1, 0], sizes = [1, 8], strides = [1, 1]} : vector<2x8xf32> to vector<1x8xf32>
    %314 = vector.broadcast %312 : vector<2x1xf32> to vector<2x8xf32>
    %315 = vector.broadcast %313 : vector<1x8xf32> to vector<2x8xf32>
    %316 = arith.mulf %314, %315 : vector<2x8xf32>
    %317 = arith.addf %311, %316 : vector<2x8xf32>
    %318 = arith.negf %317 : vector<2x8xf32>
    %319 = math.exp %318 : vector<2x8xf32>
    %cst_53 = arith.constant 1.000000e+00 : f32
    %320 = vector.broadcast %cst_53 : f32 to vector<2x8xf32>
    %321 = arith.addf %320, %319 : vector<2x8xf32>
    %322 = arith.divf %320, %321 : vector<2x8xf32>
    %323 = vector.extract_strided_slice %317 {offsets = [0, 4], sizes = [2, 2], strides = [1, 1]} : vector<2x8xf32> to vector<2x2xf32>
    %324 = math.tanh %323 : vector<2x2xf32>
    %325 = vector.extract_strided_slice %322 {offsets = [0, 0], sizes = [2, 2], strides = [1, 1]} : vector<2x8xf32> to vector<2x2xf32>
    %326 = vector.extract_strided_slice %322 {offsets = [0, 2], sizes = [2, 2], strides = [1, 1]} : vector<2x8xf32> to vector<2x2xf32>
    %327 = vector.extract_strided_slice %322 {offsets = [0, 6], sizes = [2, 2], strides = [1, 1]} : vector<2x8xf32> to vector<2x2xf32>
    %328 = arith.mulf %326, %302 : vector<2x2xf32>
    %329 = arith.mulf %325, %324 : vector<2x2xf32>
    %330 = arith.addf %328, %329 : vector<2x2xf32>
    %331 = math.tanh %330 : vector<2x2xf32>
    %332 = arith.mulf %327, %331 : vector<2x2xf32>
    %cst_54 = arith.constant dense<0xFF800000> : vector<2xf32>
    %333 = vector.multi_reduction <maximumf>, %332, %cst_54 [1] : vector<2x2xf32> to vector<2xf32>
    %334 = vector.shape_cast %333 : vector<2xf32> to vector<2x1xf32>
    %335 = vector.broadcast %334 : vector<2x1xf32> to vector<2x2xf32>
    %336 = arith.subf %332, %335 : vector<2x2xf32>
    %337 = math.exp %336 : vector<2x2xf32>
    %cst_55 = arith.constant dense<0.000000e+00> : vector<2xf32>
    %338 = vector.multi_reduction <add>, %337, %cst_55 [1] : vector<2x2xf32> to vector<2xf32>
    %339 = vector.shape_cast %338 : vector<2xf32> to vector<2x1xf32>
    %340 = math.log %339 : vector<2x1xf32>
    %341 = vector.broadcast %340 : vector<2x1xf32> to vector<2x2xf32>
    %342 = arith.subf %336, %341 : vector<2x2xf32>
    %c0_56 = arith.constant 0 : index
    %c0_57 = arith.constant 0 : index
    %343 = vector.load %arg8[%c0_56, %c0_57] : memref<2x2xf32, #tpu.memory_space<vmem>>, vector<2x2xf32>
    tpu.vector_store %arg8[%c0_56, %c0_57], %342 {strides = array<i32>} : memref<2x2xf32, #tpu.memory_space<vmem>>, vector<2x2xf32>,
    return
  }
}

</mosaic_0001>

<bundles_post_ra>
// kernel: cnnlstm_forward.1
= control target key start
LH: loop header
LB: loop body
LE: loop exit
PB: predicated region body
PF: predicated region fallthrough
CT: control target
= control target key end

     0   :  { %s1097_s9 = smov 80   ;;  %s1098_s10 = smov 96   ;;  %vm108_vm0 = vcmask 1046528   ;;  %s1432_s0 = inlined_call_operand.vmem [shape: f32[2,127], index: 0, kind: input, shape index: {}]   ;;  %s1433_s1 = inlined_call_operand.vmem [shape: f32[71,256], index: 1, kind: input, shape index: {}]   ;;  %s1434_s2 = inlined_call_operand.vmem [shape: f32[1,256], index: 2, kind: input, shape index: {}]   ;;  %s1435_s3 = inlined_call_operand.vmem [shape: f32[1,32], index: 3, kind: input, shape index: {}]   ;;  %s1436_s4 = inlined_call_operand.vmem [shape: f32[1,32], index: 4, kind: input, shape index: {}]   ;;  %s1437_s5 = inlined_call_operand.vmem [shape: f32[32,8], index: 5, kind: input, shape index: {}]   ;;  %s1438_s6 = inlined_call_operand.vmem [shape: f32[2,8], index: 6, kind: input, shape index: {}]   ;;  %s1439_s7 = inlined_call_operand.vmem [shape: f32[1,8], index: 7, kind: input, shape index: {}]   ;;  %s1440_s8 = inlined_call_operand.hbm [shape: f32[2,2], index: 8, kind: output, shape index: {}]  }
   0x1   :  { %v63_v0 = vld [vmem:[%s1432_s0] sm:$0x3]  ;;  %s1099_s13 = smov 120  }
   0x2   :  { %v51_v1 = vld [vmem:[%s1432_s0] sm:$0x3]  ;;  %65 = vrot.lane.b32.xlu1 %v63_v0, %s1097_s9 }
   0x3   :  { %53 = vrot.lane.b32.xlu0 %v51_v1, %s1098_s10  ;;  %v33_v2 = vld [vmem:[%s1432_s0] sm:$0x3] }
   0x4   :  { %35 = vrot.lane.b32.xlu2 %v33_v2, %s1099_s13  ;;  %v93_v3 = vld [vmem:[%s1433_s1 + $0x80] sm:$0x7f] }
   0x5   :  { %955 = vmatpush.msk.msra.mxu3 %vm108_vm0, %v93_v3  ;;  %935 = vmatpush.msk.msra.mxu0 %vm108_vm0, %v93_v3 }
   0x6   :  { %13 = vsyncpa [#allocation4], 0  ;;  %v69_v4 = vld [vmem:[%s1432_s0] sm:$0x3]  ;;  %s1100_s22 = smov 72   ;;  %s1101_s23 = smov 88  }
   0x7   :  { %v57_v5 = vld [vmem:[%s1432_s0] sm:$0x3]  ;;  %s1102_s24 = smov 112   ;;  %s1103_s27 = smov 104   ;;  %vm31_vm1 = vcmask 574464   ;;  %v91_v9 = vld [vmem:[%s1433_s1 + $0x70] sm:$0xff] }
   0x8   :  { %v39_v6 = vld [vmem:[%s1432_s0] sm:$0x3]  ;;  %956 = vmatpush.msra.mxu3 %v91_v9  ;;  %v94_v11 = vld [vmem:[%s1433_s1 + $0x88] sm:$0x7f]  ;;  %123 = vmatpush.msra.mxu0 %v91_v9  ;;  %v87_v12 = vld [vmem:[%s1433_s1 + $0x50] sm:$0xff]  ;;  %vm101_vm2 = vcmask 580608  }
   0x9   :  { %v45_v7 = vld [vmem:[%s1432_s0] sm:$0x3]  ;;  %938 = vmatpush.msk.msra.mxu1 %vm108_vm0, %v94_v11  ;;  %v83_v15 = vld [vmem:[%s1433_s1 + $0x30] sm:$0xff]  ;;  %v92_v16 = vld [vmem:[%s1433_s1 + $0x78] sm:$0xff]  ;;  %s1105_s21 = smov 64   ;;  %vm213_vm3 = vcmask 261120  }
   0xa   :  { %71 = vrot.lane.b32.xlu1 %v69_v4, %s1100_s22  ;;  %v30_v8 = vld [vmem:[%s1432_s0] sm:$0x3]  ;;  %v90_v18 = vld [vmem:[%s1433_s1 + $0x68] sm:$0xff]  ;;  %v79_v19 = vld [vmem:[%s1433_s1 + $0x10] sm:$0xff]  ;;  %vm215_vm4 = vcmask 523264   ;;  %vm217_vm5 = vcmask 785408  }
   0xb   :  { %59 = vrot.lane.b32.xlu0 %v57_v5, %s1101_s23  ;;  %32 = vst.msk [vmem:[#allocation2] sm:$0x3] %vm31_vm1, %v30_v8  ;;  %v89_v10 = vld [vmem:[%s1433_s1 + $0x60] sm:$0xff]  ;;  %146 = vmatpush.msra.mxu1 %v92_v16  ;;  %v88_v20 = vld [vmem:[%s1433_s1 + $0x58] sm:$0xff]  ;;  %v86_v22 = vld [vmem:[%s1433_s1 + $0x48] sm:$0xff]  ;;  %s1108_s16 = smov 4  }
   0xc   :  { %41 = vrot.lane.b32.xlu2 %v39_v6, %s1102_s24  ;;  %957 = vmatpush.msra.mxu3 %v89_v10  ;;  %v85_v13 = vld [vmem:[%s1433_s1 + $0x40] sm:$0xff]  ;;  %v84_v24 = vld [vmem:[%s1433_s1 + $0x38] sm:$0xff]  ;;  %v82_v25 = vld [vmem:[%s1433_s1 + $0x28] sm:$0xff]  ;;  %s1112_s0 = smov [#allocation3]  }
   0xd   :  { %124 = vmatpush.msra.mxu0 %v89_v10  ;;  %v81_v17 = vld [vmem:[%s1433_s1 + $0x20] sm:$0xff]  ;;  %147 = vmatpush.msra.mxu1 %v90_v18  ;;  %v80_v26 = vld [vmem:[%s1433_s1 + $0x18] sm:$0xff]  ;;  %v78_v27 = vld [vmem:[%s1433_s1 + $0x8] sm:$0xff]  ;;  %s924_s17 = sshll.u32 %s1112_s0, 4  ;;  %s925_s17 = int_to_ptr.vmem [resolvable:$true] %s924_s17 }
   0xe   :  { %958 = vmatpush.msra.mxu3 %v87_v12  ;;  %v77_v21 = vld [vmem:[%s1433_s1] sm:$0xff]  ;;  %s926_s1 = sshll.u32 %s1440_s8, 4  ;;  %s927_s1 = int_to_ptr.hbm [resolvable:$true] %s926_s1 }
   0xf   :  { %125 = vmatpush.msra.mxu0 %v87_v12  ;;  %148 = vmatpush.msra.mxu1 %v88_v20  ;;  %v95_v35 = vld [vmem:[%s1434_s2] sm:$0x3]  ;;  %s1104_s2 = smov 32  }
  0x10   :  { %959 = vmatpush.msra.mxu3 %v85_v13  ;;  %v97_v36 = vperm.slane %v95_v35, 0  ;;  %v98_v44 = vperm.slane %v95_v35, 1 }
  0x11   :  { %126 = vmatpush.msra.mxu0 %v85_v13  ;;  %149 = vmatpush.msra.mxu1 %v86_v22 }
  0x12   :  { %960 = vmatpush.msra.mxu3 %v83_v15 }
  0x13   :  { %47 = vrot.lane.b32.xlu0 %v45_v7, %s1103_s27  ;;  %127 = vmatpush.msra.mxu0 %v83_v15 }
  0x14   :  { %961 = vmatpush.msra.mxu3 %v81_v17  ;;  %150 = vmatpush.msra.mxu1 %v84_v24 }
  0x15   :  { %128 = vmatpush.msra.mxu0 %v81_v17 }
  0x16   :  { %962 = vmatpush.msra.mxu3 %v79_v19  ;;  %151 = vmatpush.msra.mxu1 %v82_v25 }
  0x17   :  { %129 = vmatpush.msra.mxu0 %v79_v19 }
  0x18   :  { %963 = vmatpush.msra.mxu3 %v77_v21  ;;  %152 = vmatpush.msra.mxu1 %v80_v26 }
  0x19   :  { %130 = vmatpush.msra.mxu0 %v77_v21 }
  0x1a   :  { %153 = vmatpush.msra.mxu1 %v78_v27 }
  0x5e   :  { %v36_v14 = vpop.permute.xlu2 %35 }
  0x5f   :  { %38 = vst.msk [vmem:[#allocation2 + $0x2] sm:$0x3] %vm31_vm1, %v36_v14 }
  0x66   :  { %v42_v23 = vpop.permute.xlu2 %41 }
  0x67   :  { %44 = vst.msk [vmem:[#allocation2 + $0x4] sm:$0x3] %vm31_vm1, %v42_v23 }
  0x74   :  { %v66_v28 = vpop.permute.xlu1 %65 }
  0x75   :  { %v54_v29 = vpop.permute.xlu0 %53  ;;  %68 = vst.msk [vmem:[#allocation2 + $0xc] sm:$0x3] %vm31_vm1, %v66_v28 }
  0x76   :  { %56 = vst.msk [vmem:[#allocation2 + $0x8] sm:$0x3] %vm31_vm1, %v54_v29 }
  0x7c   :  { %v72_v30 = vpop.permute.xlu1 %71 }
  0x7d   :  { %v60_v31 = vpop.permute.xlu0 %59  ;;  %74 = vst.msk [vmem:[#allocation2 + $0xe] sm:$0x3] %vm31_vm1, %v72_v30 }
  0x7e   :  { %62 = vst.msk [vmem:[#allocation2 + $0xa] sm:$0x3] %vm31_vm1, %v60_v31 }
  0x85   :  { %v48_v32 = vpop.permute.xlu0 %47  ;;  %v76_v33 = vld [vmem:[#allocation2 + $0x8] sm:$0xff] }
  0x86   :  { %50 = vst.msk [vmem:[#allocation2 + $0x6] sm:$0x3] %vm31_vm1, %v48_v32  ;;  %937 = vmatmul.msk.f32.vlgmr.msra.gmra.mxu3 %vm101_vm2, %v76_v33 }
  0x8d   :  { %v75_v34 = vld [vmem:[#allocation2] sm:$0xff] }
  0x8e   :  { %936 = vmatmul.msk.f32.vlgmr.msra.gmra.mxu0 %vm101_vm2, %v75_v34  ;;  %939 = vmatmul.msk.f32.vlgmr.msra.gmra.mxu1 %vm101_vm2, %v75_v34 }
  0x96   :  { %940 = vmatmul.msk.f32.gmra.mxu1 %vm101_vm2, %v76_v33 }
 0x109   :  { %v135_v37 = vpop.f32.mrf.mxu3 }
 0x10a   :  { %v136_v40 = vadd.f32 %v135_v37, %v97_v36 }
 0x10b   :  { %v132_v38 = vpop.f32.mrf.mxu0  ;;  %v155_v39 = vpop.f32.mrf.mxu1 }
 0x10c   :  { %v133_v41 = vadd.f32 %v132_v38, %v97_v36  ;;  %v156_v48 = vadd.f32 %v155_v39, %v98_v44 }
 0x10e   :  { %v161_v42 = vadd.f32 %v136_v40, %v133_v41 }
 0x110   :  { %v162_v43 = vrot.slane %v161_v42, 4 }
 0x112   :  { %v163_v45 = vadd.f32 %v162_v43, %v161_v42 }
 0x113   :  { %v158_v46 = vpop.f32.mrf.mxu1 }
 0x114   :  { %v164_v47 = vrot.slane %v163_v45, 2  ;;  %v159_v49 = vadd.f32 %v158_v46, %v98_v44 }
 0x116   :  { %v165_v50 = vadd.f32 %v164_v47, %v163_v45  ;;  %v168_v51 = vadd.f32 %v159_v49, %v156_v48 }
 0x118   :  { %v166_v52 = vrot.slane %v165_v50, 1  ;;  %v169_v53 = vrot.slane %v168_v51, 4 }
 0x11a   :  { %v170_v54 = vadd.f32 %v169_v53, %v168_v51  ;;  %v167_v55 = vadd.f32 %v166_v52, %v165_v50 }
 0x11c   :  { %v171_v56 = vrot.slane %v170_v54, 2  ;;  %184 = vrot.lane.b32.xlu0 %v167_v55, %s1104_s2  ;;  %180 = vrot.lane.b32.xlu2 %v167_v55, %s1105_s21 }
 0x11d   :  { %176 = vrot.lane.b32.xlu1 %v167_v55, %s1098_s10 }
 0x11e   :  { %v172_v57 = vadd.f32 %v171_v56, %v170_v54 }
 0x120   :  { %v173_v58 = vrot.slane %v172_v57, 1 }
 0x122   :  { %v174_v59 = vadd.f32 %v173_v58, %v172_v57 }
 0x124   :  { %198 = vrot.lane.b32.xlu0 %v174_v59, %s1104_s2  ;;  %194 = vrot.lane.b32.xlu2 %v174_v59, %s1105_s21 }
 0x125   :  { %190 = vrot.lane.b32.xlu1 %v174_v59, %s1098_s10 }
 0x176   :  { %v181_v60 = vpop.permute.xlu2 %180 }
 0x17e   :  { %v195_v5 = vpop.permute.xlu2 %194 }
 0x18e   :  { %v185_v63 = vpop.permute.xlu0 %184 }
 0x18f   :  { %v177_v61 = vpop.permute.xlu1 %176 }
 0x190   :  { %v179_v62 = vadd.f32 %v177_v61, %v167_v55 }
 0x192   :  { %v183_v0 = vadd.f32 %v181_v60, %v179_v62 }
 0x194   :  { %v187_v1 = vadd.f32 %v185_v63, %v183_v0  ;;  %v991_v0 = vld [vmem:[%s1436_s4] ss:$0 sm:$0xff] }
 0x196   :  { %v188_v2 = vadd.f32 %v187_v1, %v174_v59  ;;  %v199_v7 = vpop.permute.xlu0 %198  ;;  %v270_v59 = vld [vmem:[%s1435_s3] sm:$0x1] }
 0x197   :  { %v191_v3 = vpop.permute.xlu1 %190 }
 0x198   :  { %v193_v4 = vadd.f32 %v191_v3, %v188_v2 }
 0x19a   :  { %v197_v6 = vadd.f32 %v195_v5, %v193_v4 }
 0x19c   :  { %v201_v8 = vadd.f32 %v199_v7, %v197_v6  ;;  %v302_v7 = vld [vmem:[%s1436_s4] sm:$0x1] }
 0x19e   :  { %v202_v9 = vmul.f32 0.0078125, %v201_v8 }
 0x1a0   :  { %210 = vrot.lane.b32.xlu0 %v202_v9, %s1098_s10  ;;  %207 = vrot.lane.b32.xlu2 %v202_v9, %s1105_s21 }
 0x1a1   :  { %204 = vrot.lane.b32.xlu1 %v202_v9, %s1104_s2 }
 0x1fa   :  { %v208_v11 = vpop.permute.xlu2 %207 }
 0x212   :  { %v211_v13 = vpop.permute.xlu0 %210 }
 0x213   :  { %v205_v10 = vpop.permute.xlu1 %204 }
 0x214   :  { %v214_v12 = vsel %vm213_vm3, %v202_v9, %v205_v10 }
 0x215   :  { %v216_v14 = vsel %vm215_vm4, %v214_v12, %v208_v11 }
 0x216   :  { %v218_v15 = vsel %vm217_vm5, %v216_v14, %v211_v13 }
 0x217   :  { %v219_v16 = vperm.slane %v218_v15, 0 }
 0x219   :  { %v1263_v17 = vsub.f32 %v133_v41, %v219_v16  ;;  %v1265_v18 = vsub.f32 %v156_v48, %v219_v16  ;;  %v1267_v19 = vsub.f32 %v136_v40, %v219_v16  ;;  %v1269_v20 = vsub.f32 %v159_v49, %v219_v16 }
 0x21b   :  { %v224_v21 = vmul.f32 %v1263_v17, %v1263_v17  ;;  %v226_v22 = vmul.f32 %v1267_v19, %v1267_v19  ;;  %v225_v23 = vmul.f32 %v1265_v18, %v1265_v18  ;;  %v227_v24 = vmul.f32 %v1269_v20, %v1269_v20 }
 0x21d   :  { %v228_v25 = vadd.f32 %v226_v22, %v224_v21  ;;  %v235_v26 = vadd.f32 %v227_v24, %v225_v23 }
 0x21f   :  { %v229_v27 = vrot.slane %v228_v25, 4  ;;  %v236_v28 = vrot.slane %v235_v26, 4 }
 0x221   :  { %v230_v29 = vadd.f32 %v229_v27, %v228_v25  ;;  %v237_v30 = vadd.f32 %v236_v28, %v235_v26 }
 0x223   :  { %v231_v31 = vrot.slane %v230_v29, 2  ;;  %v238_v33 = vrot.slane %v237_v30, 2 }
 0x225   :  { %v232_v32 = vadd.f32 %v231_v31, %v230_v29  ;;  %v239_v36 = vadd.f32 %v238_v33, %v237_v30 }
 0x227   :  { %v233_v34 = vrot.slane %v232_v32, 1  ;;  %v240_v37 = vrot.slane %v239_v36, 1 }
 0x229   :  { %v234_v35 = vadd.f32 %v233_v34, %v232_v32  ;;  %v241_v38 = vadd.f32 %v240_v37, %v239_v36  ;;  %v405_v34 = vld [vmem:[%s1437_s5 + $0x18] sm:$0xff]  ;;  %v403_v36 = vld [vmem:[%s1437_s5 + $0x8] sm:$0xff]  ;;  %v402_v37 = vld [vmem:[%s1437_s5] sm:$0xff] }
 0x22a   :  { %428 = vmatpush.msra.mxu2 %v405_v34 }
 0x22b   :  { %251 = vrot.lane.b32.xlu0 %v234_v35, %s1104_s2  ;;  %247 = vrot.lane.b32.xlu2 %v234_v35, %s1105_s21 }
 0x22c   :  { %243 = vrot.lane.b32.xlu1 %v234_v35, %s1098_s10 }
 0x233   :  { %265 = vrot.lane.b32.xlu0 %v241_v38, %s1104_s2  ;;  %261 = vrot.lane.b32.xlu2 %v241_v38, %s1105_s21 }
 0x234   :  { %257 = vrot.lane.b32.xlu1 %v241_v38, %s1098_s10 }
 0x285   :  { %v248_v39 = vpop.permute.xlu2 %247 }
 0x28d   :  { %v262_v48 = vpop.permute.xlu2 %261 }
 0x29d   :  { %v252_v42 = vpop.permute.xlu0 %251 }
 0x29e   :  { %v244_v40 = vpop.permute.xlu1 %243 }
 0x29f   :  { %v246_v41 = vadd.f32 %v244_v40, %v234_v35  ;;  %v404_v35 = vld [vmem:[%s1437_s5 + $0x10] sm:$0xff] }
 0x2a0   :  { %429 = vmatpush.msra.mxu2 %v404_v35 }
 0x2a1   :  { %v250_v43 = vadd.f32 %v248_v39, %v246_v41 }
 0x2a2   :  { %430 = vmatpush.msra.mxu2 %v403_v36 }
 0x2a3   :  { %v254_v44 = vadd.f32 %v252_v42, %v250_v43 }
 0x2a4   :  { %431 = vmatpush.msra.mxu2 %v402_v37 }
 0x2a5   :  { %v255_v45 = vadd.f32 %v254_v44, %v241_v38  ;;  %v266_v50 = vpop.permute.xlu0 %265 }
 0x2a6   :  { %v258_v46 = vpop.permute.xlu1 %257 }
 0x2a7   :  { %v260_v47 = vadd.f32 %v258_v46, %v255_v45 }
 0x2a9   :  { %v264_v49 = vadd.f32 %v262_v48, %v260_v47 }
 0x2ab   :  { %v268_v51 = vadd.f32 %v266_v50, %v264_v49 }
 0x2ad   :  { %v269_v52 = vmul.f32 0.0078125, %v268_v51 }
 0x2af   :  { %v271_v53 = vadd.f32 1e-05, %v269_v52  ;;  %v439_v52 = vld [vmem:[%s1438_s6] sm:$0x3]  ;;  %s1106_s6 = smov 124  }
 0x2b1   :  { %993 = vrsqrt.f32 %v271_v53  ;;  %vm278_vm7 = vweird.f32 %v271_v53 }
 0x2b7   :  { %v994_v54 = vpop.eup %993 }
 0x2b8   :  { %v273_v55 = vmul.f32 %v994_v54, %v271_v53  ;;  %vm279_vm6 = vweird.f32 %v994_v54  ;;  %v1336_v53 = vperm.slane %v439_v52, 0 }
 0x2b9   :  { %vm280_vm8 = vmor %vm278_vm7, %vm279_vm6 }
 0x2ba   :  { %v274_v56 = vmul.f32 %v994_v54, %v273_v55  ;;  %v1343_v55 = vperm.slane %v439_v52, 1 }
 0x2bc   :  { %v275_v57 = vmul.f32 0.5, %v274_v56  ;;  %v441_v56 = vmul.f32 0.0, %v1336_v53 }
 0x2be   :  { %v276_v58 = vsub.f32 1.5, %v275_v57 }
 0x2c0   :  { %v277_v60 = vmul.f32 %v994_v54, %v276_v58 }
 0x2c2   :  { %v281_v61 = vsel %vm280_vm8, %v994_v54, %v277_v60  ;;  %v1341_v54 = vld [vmem:[%s1439_s7] ss:$0 sm:$0xff]  ;;  %s1107_s7 = smov 2  }
 0x2c3   :  { %v282_v62 = vmul.f32 %v281_v61, %v270_v59  ;;  %v444_v59 = vmul.f32 0.0, %v1343_v55 }
 0x2c5   :  { %v284_v63 = vperm.slane %v282_v62, 0 }
 0x2c7   :  { %291 = vrot.lane.b32.xlu0 %v284_v63, %s1098_s10  ;;  %288 = vrot.lane.b32.xlu2 %v284_v63, %s1105_s21 }
 0x2c8   :  { %285 = vrot.lane.b32.xlu1 %v284_v63, %s1104_s2 }
 0x2cf   :  { %311 = vrot.lane.b32.xlu0 %v991_v0, %s1098_s10  ;;  %308 = vrot.lane.b32.xlu2 %v991_v0, %s1105_s21 }
 0x2d0   :  { %305 = vrot.lane.b32.xlu1 %v991_v0, %s1104_s2 }
 0x321   :  { %v289_v1 = vpop.permute.xlu2 %288 }
 0x329   :  { %v309_v9 = vpop.permute.xlu2 %308 }
 0x339   :  { %v292_v2 = vpop.permute.xlu0 %291 }
 0x33a   :  { %v286_v3 = vpop.permute.xlu1 %285 }
 0x33b   :  { %v294_v4 = vsel %vm213_vm3, %v282_v62, %v286_v3 }
 0x33c   :  { %v295_v5 = vsel %vm215_vm4, %v294_v4, %v289_v1 }
 0x33d   :  { %v296_v6 = vsel %vm217_vm5, %v295_v5, %v292_v2 }
 0x33e   :  { %v297_v8 = vperm.slane %v296_v6, 0 }
 0x340   :  { %v298_v15 = vmul.f32 %v297_v8, %v1263_v17  ;;  %v299_v21 = vmul.f32 %v297_v8, %v1265_v18  ;;  %v300_v22 = vmul.f32 %v297_v8, %v1267_v19  ;;  %v301_v23 = vmul.f32 %v297_v8, %v1269_v20 }
 0x341   :  { %v312_v11 = vpop.permute.xlu0 %311 }
 0x342   :  { %v306_v10 = vpop.permute.xlu1 %305 }
 0x343   :  { %v314_v12 = vsel %vm213_vm3, %v302_v7, %v306_v10 }
 0x344   :  { %v315_v13 = vsel %vm215_vm4, %v314_v12, %v309_v9 }
 0x345   :  { %v316_v14 = vsel %vm217_vm5, %v315_v13, %v312_v11 }
 0x346   :  { %v317_v16 = vperm.slane %v316_v14, 0 }
 0x348   :  { %v318_v24 = vadd.f32 %v317_v16, %v298_v15  ;;  %v319_v25 = vadd.f32 %v317_v16, %v299_v21  ;;  %v1310_v26 = vadd.f32 %v317_v16, %v300_v22  ;;  %v1312_v27 = vadd.f32 %v317_v16, %v301_v23 }
 0x349   :  { %v1109_v22 = vmov 7   ;;  %v1110_v23 = vmov 6  }
 0x34a   :  { %v326_v28 = vmin.f32 %v318_v24, 0.0  ;;  %v327_v29 = vmin.f32 %v319_v25, 0.0  ;;  %vm322_vm9 = vcmp.gt.f32.partialorder %v318_v24, 0.0  ;;  %vm323_vm10 = vcmp.gt.f32.partialorder %v319_v25, 0.0  ;;  %981 = vset.pattern.permute.xlu2 %v1109_v22  ;;  %980 = vset.pattern.permute.xlu1 %v1110_v23 }
 0x34b   :  { %982 = vset.pattern.permute.xlu0 %v1110_v23  ;;  %vm324_vm8 = vcmp.gt.f32.partialorder %v1310_v26, 0.0 }
 0x34c   :  { %v330_v30 = vmul.f32 1.442695, %v326_v28  ;;  %v332_v31 = vmul.f32 1.442695, %v327_v29 }
 0x34e   :  { %995 = vpow2.f32 %v330_v30 }
 0x34f   :  { %997 = vpow2.f32 %v332_v31 }
 0x354   :  { %v996_v17 = vpop.eup %995 }
 0x355   :  { %v941_v32 = vadd.f32 -1.0, %v996_v17  ;;  %v998_v33 = vpop.eup %997 }
 0x356   :  { %v942_v19 = vadd.f32 -1.0, %v998_v33 }
 0x357   :  { %v342_v18 = vsel %vm322_vm9, %v318_v24, %v941_v32  ;;  %vm325_vm9 = vcmp.gt.f32.partialorder %v1312_v27, 0.0 }
 0x358   :  { %364 = vrot.lane.b32.xlu0 %v342_v18, %s1104_s2  ;;  %356 = vrot.lane.b32.xlu2 %v342_v18, %s1105_s21  ;;  %v343_v20 = vsel %vm323_vm10, %v319_v25, %v942_v19 }
 0x359   :  { %348 = vrot.lane.b32.xlu1 %v342_v18, %s1098_s10 }
 0x360   :  { %392 = vrot.lane.b32.xlu0 %v343_v20, %s1104_s2  ;;  %384 = vrot.lane.b32.xlu2 %v343_v20, %s1105_s21 }
 0x361   :  { %376 = vrot.lane.b32.xlu1 %v343_v20, %s1098_s10 }
 0x3b2   :  { %v357_v38 = vpop.permute.xlu2 %356 }
 0x3ba   :  { %v385_v47 = vpop.permute.xlu2 %384 }
 0x3ca   :  { %v365_v41 = vpop.permute.xlu0 %364 }
 0x3cb   :  { %v349_v39 = vpop.permute.xlu1 %348 }
 0x3cc   :  { %v354_v40 = vadd.f32 %v349_v39, %v342_v18 }
 0x3ce   :  { %v362_v42 = vadd.f32 %v357_v38, %v354_v40 }
 0x3d0   :  { %v370_v43 = vadd.f32 %v365_v41, %v362_v42 }
 0x3d2   :  { %v372_v44 = vadd.f32 %v370_v43, %v343_v20  ;;  %v393_v49 = vpop.permute.xlu0 %392 }
 0x3d3   :  { %v377_v45 = vpop.permute.xlu1 %376 }
 0x3d4   :  { %v382_v46 = vadd.f32 %v377_v45, %v372_v44 }
 0x3d6   :  { %v390_v48 = vadd.f32 %v385_v47, %v382_v46 }
 0x3d8   :  { %v398_v50 = vadd.f32 %v393_v49, %v390_v48 }
 0x3da   :  { %v400_v51 = vmul.f32 0.125, %v398_v50 }
 0x3dc   :  { %945 = vmatmul.msk.f32.vlgmr.msra.gmra.mxu2 %vm213_vm3, %v400_v51 }
 0x45f   :  { %v433_v57 = vpop.f32.mrf.mxu2 }
 0x460   :  { %v1347_v58 = vadd.f32 %v1341_v54, %v433_v57 }
 0x462   :  { %v442_v60 = vadd.f32 %v441_v56, %v1347_v58 }
 0x464   :  { %v445_v61 = vadd.f32 %v444_v59, %v442_v60 }
 0x466   :  { %999 = vtanh.f32 %v445_v61  ;;  %v947_v63 = vmul.f32 -1.442695, %v445_v61 }
 0x468   :  { %1001 = vpow2.f32 %v947_v63 }
 0x46c   :  { %v1000_v62 = vpop.eup %999 }
 0x46d   :  { %468 = vrot.lane.b32.xlu1 %v1000_v62, %s1106_s6 }
 0x46e   :  { %v1002_v0 = vpop.eup %1001 }
 0x46f   :  { %v449_v1 = vadd.f32 1.0, %v1002_v0 }
 0x471   :  { %1003 = vrcp.f32 %v449_v1  ;;  %v461_v7 = vand.u32 2147483648, %v449_v1  ;;  %vm455_vm12 = vweird.f32 %v449_v1  ;;  %v459_v8 = vand.u32 2147483647, %v449_v1 }
 0x473   :  { %v462_v10 = vor.u32 1.1754944e-38, %v461_v7  ;;  %vm460_vm14 = vcmp.eq.f32.partialorder %v459_v8, 8.507059e+37 }
 0x477   :  { %v1004_v2 = vpop.eup %1003 }
 0x478   :  { %v451_v3 = vmul.f32 %v1004_v2, %v449_v1  ;;  %vm456_vm11 = vweird.f32 %v1004_v2 }
 0x479   :  { %vm457_vm13 = vmor %vm455_vm12, %vm456_vm11 }
 0x47a   :  { %v452_v4 = vsub.f32 1.0, %v451_v3 }
 0x47c   :  { %v453_v5 = vmul.f32 %v1004_v2, %v452_v4 }
 0x47e   :  { %v454_v6 = vadd.f32 %v1004_v2, %v453_v5 }
 0x480   :  { %v458_v9 = vsel %vm457_vm13, %v1004_v2, %v454_v6 }
 0x481   :  { %v463_v12 = vsel %vm460_vm14, %v462_v10, %v458_v9 }
 0x482   :  { %v466_v14 = vmul.f32 0.0, %v463_v12 }
 0x4df   :  { %v469_v11 = vpop.permute.xlu1 %468 }
 0x4e0   :  { %v471_v13 = vmul.f32 %v469_v11, %v463_v12 }
 0x4e2   :  { %473 = vrot.lane.b32.xlu2 %v471_v13, %s1107_s7 }
 0x53c   :  { %v474_v15 = vpop.permute.xlu2 %473 }
 0x53d   :  { %v476_v16 = vadd.f32 %v474_v15, %v466_v14 }
 0x53f   :  { %1005 = vtanh.f32 %v476_v16  ;;  %v523_v48 = vrot.slane %v476_v16, 6 }
 0x545   :  { %v1006_v21 = vpop.eup %1005 }
 0x546   :  { %479 = vrot.lane.b32.xlu0 %v1006_v21, %s1108_s16 }
 0x5b8   :  { %v480_v24 = vpop.permute.xlu0 %479 }
 0x5b9   :  { %v482_v25 = vmul.f32 %v480_v24, %v463_v12 }
 0x5bb   :  { %494 = vperm.xlu2 %981, %v482_v25   ;;  %485 = vperm.xlu1 %980, %v482_v25   ;;  %v328_v25 = vmin.f32 %v1310_v26, 0.0 }
 0x5c3   :  { %983 = vset.pattern.permute.xlu1 %v1109_v22  ;;  %984 = vset.pattern.permute.xlu2 %v1110_v23 }
 0x615   :  { %v495_v28 = vpop.permute.xlu2 %494 }
 0x616   :  { %v497_v30 = vmul.f32 %v495_v28, %v1343_v55 }
 0x618   :  { %v499_v32 = vrot.slane %v497_v30, 6 }
 0x62d   :  { %v486_v29 = vpop.permute.xlu1 %485 }
 0x62e   :  { %v488_v31 = vmul.f32 %v486_v29, %v1336_v53 }
 0x630   :  { %v490_v17 = vrot.slane %v488_v31, 6  ;;  %v334_v31 = vmul.f32 1.442695, %v328_v25 }
 0x632   :  { %v492_v18 = vadd.f32 %v490_v17, %v1347_v58 }
 0x634   :  { %v501_v33 = vadd.f32 %v499_v32, %v492_v18  ;;  %v329_v32 = vmin.f32 %v1312_v27, 0.0 }
 0x636   :  { %1007 = vtanh.f32 %v501_v33  ;;  %v948_v20 = vmul.f32 -1.442695, %v501_v33  ;;  %v336_v18 = vmul.f32 1.442695, %v329_v32 }
 0x638   :  { %1009 = vpow2.f32 %v948_v20 }
 0x63c   :  { %v1008_v19 = vpop.eup %1007 }
 0x63d   :  { %527 = vrot.lane.b32.xlu0 %v1008_v19, %s1106_s6 }
 0x63e   :  { %v1010_v34 = vpop.eup %1009 }
 0x63f   :  { %v505_v35 = vadd.f32 1.0, %v1010_v34 }
 0x641   :  { %1011 = vrcp.f32 %v505_v35  ;;  %v517_v41 = vand.u32 2147483648, %v505_v35  ;;  %vm511_vm0 = vweird.f32 %v505_v35  ;;  %v515_v42 = vand.u32 2147483647, %v505_v35 }
 0x643   :  { %v518_v44 = vor.u32 1.1754944e-38, %v517_v41  ;;  %vm516_vm2 = vcmp.eq.f32.partialorder %v515_v42, 8.507059e+37 }
 0x647   :  { %v1012_v36 = vpop.eup %1011 }
 0x648   :  { %v507_v37 = vmul.f32 %v1012_v36, %v505_v35  ;;  %vm512_vm15 = vweird.f32 %v1012_v36 }
 0x649   :  { %vm513_vm1 = vmor %vm511_vm0, %vm512_vm15 }
 0x64a   :  { %v508_v38 = vsub.f32 1.0, %v507_v37 }
 0x64c   :  { %v509_v39 = vmul.f32 %v1012_v36, %v508_v38 }
 0x64e   :  { %v510_v40 = vadd.f32 %v1012_v36, %v509_v39 }
 0x650   :  { %v514_v43 = vsel %vm513_vm1, %v1012_v36, %v510_v40 }
 0x651   :  { %v519_v46 = vsel %vm516_vm2, %v518_v44, %v514_v43 }
 0x652   :  { %v525_v49 = vmul.f32 %v523_v48, %v519_v46 }
 0x6af   :  { %v528_v45 = vpop.permute.xlu0 %527 }
 0x6b0   :  { %v530_v47 = vmul.f32 %v528_v45, %v519_v46 }
 0x6b2   :  { %532 = vrot.lane.b32.xlu1 %v530_v47, %s1107_s7 }
 0x724   :  { %v533_v50 = vpop.permute.xlu1 %532 }
 0x725   :  { %v535_v51 = vadd.f32 %v533_v50, %v525_v49 }
 0x727   :  { %1013 = vtanh.f32 %v535_v51  ;;  %v582_v28 = vrot.slane %v535_v51, 6 }
 0x72d   :  { %v1014_v52 = vpop.eup %1013 }
 0x72e   :  { %538 = vrot.lane.b32.xlu2 %v1014_v52, %s1108_s16 }
 0x788   :  { %v539_v56 = vpop.permute.xlu2 %538 }
 0x789   :  { %v541_v57 = vmul.f32 %v539_v56, %v519_v46 }
 0x78b   :  { %553 = vperm.xlu1 %983, %v541_v57   ;;  %544 = vperm.xlu0 %982, %v541_v57  }
 0x7fd   :  { %v554_v59 = vpop.permute.xlu1 %553  ;;  %v545_v60 = vpop.permute.xlu0 %544 }
 0x7fe   :  { %v556_v61 = vmul.f32 %v554_v59, %v1343_v55  ;;  %v547_v62 = vmul.f32 %v545_v60, %v1336_v53 }
 0x800   :  { %v549_v63 = vrot.slane %v547_v62, 6  ;;  %v558_v0 = vrot.slane %v556_v61, 6 }
 0x802   :  { %v551_v1 = vadd.f32 %v549_v63, %v1347_v58 }
 0x804   :  { %v560_v2 = vadd.f32 %v558_v0, %v551_v1 }
 0x806   :  { %1015 = vtanh.f32 %v560_v2  ;;  %v949_v4 = vmul.f32 -1.442695, %v560_v2 }
 0x808   :  { %1017 = vpow2.f32 %v949_v4 }
 0x80c   :  { %v1016_v3 = vpop.eup %1015 }
 0x80d   :  { %586 = vrot.lane.b32.xlu2 %v1016_v3, %s1106_s6 }
 0x80e   :  { %v1018_v5 = vpop.eup %1017 }
 0x80f   :  { %v564_v6 = vadd.f32 1.0, %v1018_v5 }
 0x811   :  { %1019 = vrcp.f32 %v564_v6  ;;  %v576_v12 = vand.u32 2147483648, %v564_v6  ;;  %vm570_vm5 = vweird.f32 %v564_v6  ;;  %v574_v13 = vand.u32 2147483647, %v564_v6 }
 0x813   :  { %v577_v15 = vor.u32 1.1754944e-38, %v576_v12  ;;  %vm575_vm7 = vcmp.eq.f32.partialorder %v574_v13, 8.507059e+37 }
 0x817   :  { %v1020_v7 = vpop.eup %1019 }
 0x818   :  { %v566_v8 = vmul.f32 %v1020_v7, %v564_v6  ;;  %vm571_vm4 = vweird.f32 %v1020_v7 }
 0x819   :  { %vm572_vm6 = vmor %vm570_vm5, %vm571_vm4 }
 0x81a   :  { %v567_v9 = vsub.f32 1.0, %v566_v8 }
 0x81c   :  { %v568_v10 = vmul.f32 %v1020_v7, %v567_v9 }
 0x81e   :  { %v569_v11 = vadd.f32 %v1020_v7, %v568_v10 }
 0x820   :  { %v573_v14 = vsel %vm572_vm6, %v1020_v7, %v569_v11 }
 0x821   :  { %v578_v21 = vsel %vm575_vm7, %v577_v15, %v573_v14 }
 0x822   :  { %v584_v29 = vmul.f32 %v582_v28, %v578_v21 }
 0x867   :  { %v587_v16 = vpop.permute.xlu2 %586 }
 0x868   :  { %v589_v24 = vmul.f32 %v587_v16, %v578_v21 }
 0x86a   :  { %591 = vrot.lane.b32.xlu1 %v589_v24, %s1107_s7 }
 0x8dc   :  { %v592_v30 = vpop.permute.xlu1 %591 }
 0x8dd   :  { %v1371_v17 = vadd.f32 %v592_v30, %v584_v29 }
 0x8df   :  { %1021 = vtanh.f32 %v1371_v17  ;;  %v641_v15 = vrot.slane %v1371_v17, 6 }
 0x8e0   :  { %1023 = vpow2.f32 %v334_v31 }
 0x8e1   :  { %1025 = vpow2.f32 %v336_v18 }
 0x8e5   :  { %v1022_v33 = vpop.eup %1021 }
 0x8e6   :  { %v1024_v19 = vpop.eup %1023  ;;  %597 = vrot.lane.b32.xlu2 %v1022_v33, %s1108_s16 }
 0x8e7   :  { %v943_v20 = vadd.f32 -1.0, %v1024_v19  ;;  %v1026_v35 = vpop.eup %1025 }
 0x8e8   :  { %v944_v36 = vadd.f32 -1.0, %v1026_v35 }
 0x8e9   :  { %v344_v34 = vsel %vm324_vm8, %v1310_v26, %v943_v20 }
 0x8ea   :  { %v345_v37 = vsel %vm325_vm9, %v1312_v27, %v944_v36 }
 0x8ee   :  { %350 = vrot.lane.b32.xlu2 %v344_v34, %s1098_s10 }
 0x8f6   :  { %378 = vrot.lane.b32.xlu2 %v345_v37, %s1098_s10  ;;  %s1111_s10 = smov 122  }
 0x940   :  { %v598_v38 = vpop.permute.xlu2 %597 }
 0x941   :  { %v600_v39 = vmul.f32 %v598_v38, %v578_v21 }
 0x943   :  { %612 = vperm.xlu1 %983, %v600_v39   ;;  %603 = vperm.xlu0 %982, %v600_v39  }
 0x948   :  { %v351_v43 = vpop.permute.xlu2 %350 }
 0x949   :  { %v355_v46 = vadd.f32 %v351_v43, %v344_v34 }
 0x94b   :  { %366 = vrot.lane.b32.xlu1 %v344_v34, %s1104_s2  ;;  %358 = vrot.lane.b32.xlu0 %v344_v34, %s1105_s21 }
 0x94c   :  { %985 = vset.pattern.permute.xlu0 %v1109_v22  ;;  %986 = vset.pattern.permute.xlu1 %v1110_v23 }
 0x950   :  { %v379_v56 = vpop.permute.xlu2 %378 }
 0x953   :  { %394 = vrot.lane.b32.xlu1 %v345_v37, %s1104_s2  ;;  %386 = vrot.lane.b32.xlu0 %v345_v37, %s1105_s21 }
 0x9b5   :  { %v613_v26 = vpop.permute.xlu1 %612  ;;  %v604_v27 = vpop.permute.xlu0 %603 }
 0x9b6   :  { %v615_v40 = vmul.f32 %v613_v26, %v1343_v55  ;;  %v606_v41 = vmul.f32 %v604_v27, %v1336_v53 }
 0x9b8   :  { %v608_v42 = vrot.slane %v606_v41, 6  ;;  %v617_v44 = vrot.slane %v615_v40, 6 }
 0x9ba   :  { %v610_v45 = vadd.f32 %v608_v42, %v1347_v58 }
 0x9bc   :  { %v619_v47 = vadd.f32 %v617_v44, %v610_v45 }
 0x9bd   :  { %v367_v48 = vpop.permute.xlu1 %366  ;;  %v359_v49 = vpop.permute.xlu0 %358 }
 0x9be   :  { %1027 = vtanh.f32 %v619_v47  ;;  %v363_v50 = vadd.f32 %v359_v49, %v355_v46  ;;  %v950_v58 = vmul.f32 -1.442695, %v619_v47 }
 0x9c0   :  { %v371_v51 = vadd.f32 %v367_v48, %v363_v50  ;;  %1029 = vpow2.f32 %v950_v58 }
 0x9c2   :  { %v373_v52 = vadd.f32 %v371_v51, %v345_v37 }
 0x9c4   :  { %v1028_v57 = vpop.eup %1027  ;;  %v383_v59 = vadd.f32 %v379_v56, %v373_v52 }
 0x9c5   :  { %645 = vrot.lane.b32.xlu2 %v1028_v57, %s1106_s6  ;;  %v387_v60 = vpop.permute.xlu0 %386  ;;  %v395_v62 = vpop.permute.xlu1 %394 }
 0x9c6   :  { %v391_v61 = vadd.f32 %v387_v60, %v383_v59  ;;  %v1030_v1 = vpop.eup %1029 }
 0x9c7   :  { %v623_v2 = vadd.f32 1.0, %v1030_v1 }
 0x9c8   :  { %v399_v63 = vadd.f32 %v395_v62, %v391_v61 }
 0x9c9   :  { %1031 = vrcp.f32 %v623_v2  ;;  %v635_v8 = vand.u32 2147483648, %v623_v2  ;;  %vm629_vm11 = vweird.f32 %v623_v2  ;;  %v633_v9 = vand.u32 2147483647, %v623_v2 }
 0x9ca   :  { %v401_v0 = vmul.f32 0.125, %v399_v63 }
 0x9cb   :  { %v636_v11 = vor.u32 1.1754944e-38, %v635_v8  ;;  %vm634_vm13 = vcmp.eq.f32.partialorder %v633_v9, 8.507059e+37 }
 0x9cc   :  { %946 = vmatmul.msk.f32.gmra.mxu2 %vm213_vm3, %v401_v0 }
 0x9cf   :  { %v1032_v3 = vpop.eup %1031 }
 0x9d0   :  { %v625_v4 = vmul.f32 %v1032_v3, %v623_v2  ;;  %vm630_vm10 = vweird.f32 %v1032_v3 }
 0x9d1   :  { %vm631_vm12 = vmor %vm629_vm11, %vm630_vm10 }
 0x9d2   :  { %v626_v5 = vsub.f32 1.0, %v625_v4 }
 0x9d4   :  { %v627_v6 = vmul.f32 %v1032_v3, %v626_v5 }
 0x9d6   :  { %v628_v7 = vadd.f32 %v1032_v3, %v627_v6 }
 0x9d8   :  { %v632_v10 = vsel %vm631_vm12, %v1032_v3, %v628_v7 }
 0x9d9   :  { %v637_v12 = vsel %vm634_vm13, %v636_v11, %v632_v10 }
 0x9da   :  { %v643_v16 = vmul.f32 %v641_v15, %v637_v12 }
 0xa1f   :  { %v646_v13 = vpop.permute.xlu2 %645 }
 0xa20   :  { %v648_v14 = vmul.f32 %v646_v13, %v637_v12 }
 0xa22   :  { %650 = vrot.lane.b32.xlu0 %v648_v14, %s1107_s7 }
 0xa4f   :  { %v436_v32 = vpop.f32.mrf.mxu2 }
 0xa50   :  { %v1398_v19 = vadd.f32 %v1341_v54, %v436_v32 }
 0xa94   :  { %v651_v21 = vpop.permute.xlu0 %650 }
 0xa95   :  { %v653_v24 = vadd.f32 %v651_v21, %v643_v16 }
 0xa97   :  { %1033 = vtanh.f32 %v653_v24  ;;  %v700_v49 = vrot.slane %v653_v24, 6 }
 0xa9d   :  { %v1034_v25 = vpop.eup %1033 }
 0xa9e   :  { %656 = vrot.lane.b32.xlu1 %v1034_v25, %s1108_s16 }
 0xb10   :  { %v657_v28 = vpop.permute.xlu1 %656 }
 0xb11   :  { %v659_v29 = vmul.f32 %v657_v28, %v637_v12 }
 0xb13   :  { %671 = vperm.xlu0 %985, %v659_v29   ;;  %662 = vperm.xlu2 %984, %v659_v29  }
 0xb6d   :  { %v663_v30 = vpop.permute.xlu2 %662 }
 0xb6e   :  { %v665_v31 = vmul.f32 %v663_v30, %v1336_v53 }
 0xb70   :  { %v667_v18 = vrot.slane %v665_v31, 6 }
 0xb72   :  { %v669_v20 = vadd.f32 %v667_v18, %v1398_v19 }
 0xb85   :  { %v672_v33 = vpop.permute.xlu0 %671 }
 0xb86   :  { %v674_v17 = vmul.f32 %v672_v33, %v1343_v55 }
 0xb88   :  { %v676_v34 = vrot.slane %v674_v17, 6 }
 0xb8a   :  { %v678_v35 = vadd.f32 %v676_v34, %v669_v20 }
 0xb8c   :  { %1035 = vtanh.f32 %v678_v35  ;;  %v951_v37 = vmul.f32 -1.442695, %v678_v35 }
 0xb8e   :  { %1037 = vpow2.f32 %v951_v37 }
 0xb92   :  { %v1036_v36 = vpop.eup %1035 }
 0xb93   :  { %704 = vrot.lane.b32.xlu1 %v1036_v36, %s1106_s6 }
 0xb94   :  { %v1038_v38 = vpop.eup %1037 }
 0xb95   :  { %v682_v39 = vadd.f32 1.0, %v1038_v38 }
 0xb97   :  { %1039 = vrcp.f32 %v682_v39  ;;  %v694_v42 = vand.u32 2147483648, %v682_v39  ;;  %vm688_vm14 = vweird.f32 %v682_v39  ;;  %v692_v43 = vand.u32 2147483647, %v682_v39 }
 0xb99   :  { %v695_v45 = vor.u32 1.1754944e-38, %v694_v42  ;;  %vm693_vm0 = vcmp.eq.f32.partialorder %v692_v43, 8.507059e+37 }
 0xb9d   :  { %v1040_v26 = vpop.eup %1039 }
 0xb9e   :  { %v684_v27 = vmul.f32 %v1040_v26, %v682_v39  ;;  %vm689_vm3 = vweird.f32 %v1040_v26 }
 0xb9f   :  { %vm690_vm15 = vmor %vm688_vm14, %vm689_vm3  ;;  %vm896_vm3 = vcmask 64566   ;;  %vm907_vm14 = vcmask 15366  }
 0xba0   :  { %v685_v40 = vsub.f32 1.0, %v684_v27 }
 0xba2   :  { %v686_v54 = vmul.f32 %v1040_v26, %v685_v40 }
 0xba4   :  { %v687_v41 = vadd.f32 %v1040_v26, %v686_v54 }
 0xba6   :  { %v691_v44 = vsel %vm690_vm15, %v1040_v26, %v687_v41 }
 0xba7   :  { %v696_v47 = vsel %vm693_vm0, %v695_v45, %v691_v44 }
 0xba8   :  { %v702_v50 = vmul.f32 %v700_v49, %v696_v47 }
 0xc05   :  { %v705_v46 = vpop.permute.xlu1 %704 }
 0xc06   :  { %v707_v48 = vmul.f32 %v705_v46, %v696_v47 }
 0xc08   :  { %709 = vrot.lane.b32.xlu2 %v707_v48, %s1107_s7 }
 0xc62   :  { %v710_v51 = vpop.permute.xlu2 %709 }
 0xc63   :  { %v712_v52 = vadd.f32 %v710_v51, %v702_v50 }
 0xc65   :  { %1041 = vtanh.f32 %v712_v52  ;;  %v759_v24 = vrot.slane %v712_v52, 6 }
 0xc6b   :  { %v1042_v56 = vpop.eup %1041 }
 0xc6c   :  { %715 = vrot.lane.b32.xlu1 %v1042_v56, %s1108_s16 }
 0xcde   :  { %v716_v57 = vpop.permute.xlu1 %715 }
 0xcdf   :  { %v718_v59 = vmul.f32 %v716_v57, %v696_v47 }
 0xce1   :  { %730 = vperm.xlu0 %985, %v718_v59   ;;  %721 = vperm.xlu2 %984, %v718_v59  }
 0xce9   :  { %987 = vset.pattern.permute.xlu2 %v1109_v22  ;;  %988 = vset.pattern.permute.xlu0 %v1110_v23 }
 0xd3b   :  { %v722_v60 = vpop.permute.xlu2 %721 }
 0xd3c   :  { %v724_v61 = vmul.f32 %v722_v60, %v1336_v53 }
 0xd3e   :  { %v726_v62 = vrot.slane %v724_v61, 6 }
 0xd40   :  { %v728_v58 = vadd.f32 %v726_v62, %v1398_v19 }
 0xd53   :  { %v731_v63 = vpop.permute.xlu0 %730 }
 0xd54   :  { %v733_v0 = vmul.f32 %v731_v63, %v1343_v55 }
 0xd56   :  { %v735_v1 = vrot.slane %v733_v0, 6 }
 0xd58   :  { %v737_v2 = vadd.f32 %v735_v1, %v728_v58 }
 0xd5a   :  { %1043 = vtanh.f32 %v737_v2  ;;  %v952_v4 = vmul.f32 -1.442695, %v737_v2 }
 0xd5c   :  { %1045 = vpow2.f32 %v952_v4 }
 0xd60   :  { %v1044_v3 = vpop.eup %1043 }
 0xd61   :  { %763 = vrot.lane.b32.xlu1 %v1044_v3, %s1106_s6 }
 0xd62   :  { %v1046_v5 = vpop.eup %1045 }
 0xd63   :  { %v741_v6 = vadd.f32 1.0, %v1046_v5 }
 0xd65   :  { %1047 = vrcp.f32 %v741_v6  ;;  %v753_v11 = vand.u32 2147483648, %v741_v6  ;;  %vm747_vm2 = vweird.f32 %v741_v6  ;;  %v751_v12 = vand.u32 2147483647, %v741_v6 }
 0xd67   :  { %v754_v14 = vor.u32 1.1754944e-38, %v753_v11  ;;  %vm752_vm5 = vcmp.eq.f32.partialorder %v751_v12, 8.507059e+37 }
 0xd6b   :  { %v1048_v23 = vpop.eup %1047 }
 0xd6c   :  { %v743_v7 = vmul.f32 %v1048_v23, %v741_v6  ;;  %vm748_vm1 = vweird.f32 %v1048_v23 }
 0xd6d   :  { %vm749_vm4 = vmor %vm747_vm2, %vm748_vm1 }
 0xd6e   :  { %v744_v8 = vsub.f32 1.0, %v743_v7 }
 0xd70   :  { %v745_v9 = vmul.f32 %v1048_v23, %v744_v8 }
 0xd72   :  { %v746_v10 = vadd.f32 %v1048_v23, %v745_v9 }
 0xd74   :  { %v750_v13 = vsel %vm749_vm4, %v1048_v23, %v746_v10 }
 0xd75   :  { %v755_v16 = vsel %vm752_vm5, %v754_v14, %v750_v13 }
 0xd76   :  { %v761_v25 = vmul.f32 %v759_v24, %v755_v16 }
 0xdd3   :  { %v764_v15 = vpop.permute.xlu1 %763 }
 0xdd4   :  { %v766_v21 = vmul.f32 %v764_v15, %v755_v16 }
 0xdd6   :  { %768 = vrot.lane.b32.xlu2 %v766_v21, %s1107_s7 }
 0xe30   :  { %v769_v28 = vpop.permute.xlu2 %768 }
 0xe31   :  { %v771_v29 = vadd.f32 %v769_v28, %v761_v25 }
 0xe33   :  { %1049 = vtanh.f32 %v771_v29  ;;  %v818_v51 = vrot.slane %v771_v29, 6 }
 0xe39   :  { %v1050_v30 = vpop.eup %1049 }
 0xe3a   :  { %774 = vrot.lane.b32.xlu0 %v1050_v30, %s1108_s16 }
 0xeac   :  { %v775_v31 = vpop.permute.xlu0 %774 }
 0xead   :  { %v777_v32 = vmul.f32 %v775_v31, %v755_v16 }
 0xeaf   :  { %789 = vperm.xlu2 %987, %v777_v32   ;;  %780 = vperm.xlu1 %986, %v777_v32  }
 0xeb7   :  { %989 = vset.pattern.permute.xlu1 %v1109_v22 }
 0xf09   :  { %v790_v18 = vpop.permute.xlu2 %789 }
 0xf0a   :  { %v792_v17 = vmul.f32 %v790_v18, %v1343_v55 }
 0xf0c   :  { %v794_v35 = vrot.slane %v792_v17, 6 }
 0xf21   :  { %v781_v33 = vpop.permute.xlu1 %780 }
 0xf22   :  { %v783_v20 = vmul.f32 %v781_v33, %v1336_v53 }
 0xf24   :  { %v785_v34 = vrot.slane %v783_v20, 6 }
 0xf26   :  { %v787_v36 = vadd.f32 %v785_v34, %v1398_v19 }
 0xf28   :  { %v796_v37 = vadd.f32 %v794_v35, %v787_v36 }
 0xf2a   :  { %1051 = vtanh.f32 %v796_v37  ;;  %v953_v39 = vmul.f32 -1.442695, %v796_v37 }
 0xf2c   :  { %1053 = vpow2.f32 %v953_v39 }
 0xf30   :  { %v1052_v38 = vpop.eup %1051 }
 0xf31   :  { %822 = vrot.lane.b32.xlu0 %v1052_v38, %s1106_s6 }
 0xf32   :  { %v1054_v26 = vpop.eup %1053 }
 0xf33   :  { %v800_v27 = vadd.f32 1.0, %v1054_v26 }
 0xf35   :  { %1055 = vrcp.f32 %v800_v27  ;;  %v812_v44 = vand.u32 2147483648, %v800_v27  ;;  %vm806_vm7 = vweird.f32 %v800_v27  ;;  %v810_v45 = vand.u32 2147483647, %v800_v27 }
 0xf37   :  { %v813_v47 = vor.u32 1.1754944e-38, %v812_v44  ;;  %vm811_vm9 = vcmp.eq.f32.partialorder %v810_v45, 8.507059e+37 }
 0xf3b   :  { %v1056_v40 = vpop.eup %1055 }
 0xf3c   :  { %v802_v54 = vmul.f32 %v1056_v40, %v800_v27  ;;  %vm807_vm6 = vweird.f32 %v1056_v40 }
 0xf3d   :  { %vm808_vm8 = vmor %vm806_vm7, %vm807_vm6 }
 0xf3e   :  { %v803_v41 = vsub.f32 1.0, %v802_v54 }
 0xf40   :  { %v804_v42 = vmul.f32 %v1056_v40, %v803_v41 }
 0xf42   :  { %v805_v43 = vadd.f32 %v1056_v40, %v804_v42 }
 0xf44   :  { %v809_v46 = vsel %vm808_vm8, %v1056_v40, %v805_v43 }
 0xf45   :  { %v814_v49 = vsel %vm811_vm9, %v813_v47, %v809_v46 }
 0xf46   :  { %v820_v52 = vmul.f32 %v818_v51, %v814_v49 }
 0xfa3   :  { %v823_v48 = vpop.permute.xlu0 %822 }
 0xfa4   :  { %v825_v50 = vmul.f32 %v823_v48, %v814_v49 }
 0xfa6   :  { %827 = vrot.lane.b32.xlu1 %v825_v50, %s1107_s7 }
0x1018   :  { %v828_v56 = vpop.permute.xlu1 %827 }
0x1019   :  { %v830_v57 = vadd.f32 %v828_v56, %v820_v52 }
0x101b   :  { %1057 = vtanh.f32 %v830_v57  ;;  %v877_v16 = vrot.slane %v830_v57, 6 }
0x1021   :  { %v1058_v59 = vpop.eup %1057 }
0x1022   :  { %833 = vrot.lane.b32.xlu2 %v1058_v59, %s1108_s16 }
0x107c   :  { %v834_v60 = vpop.permute.xlu2 %833 }
0x107d   :  { %v836_v61 = vmul.f32 %v834_v60, %v814_v49 }
0x107f   :  { %848 = vperm.xlu1 %989, %v836_v61   ;;  %839 = vperm.xlu0 %988, %v836_v61  }
0x1087   :  { %990 = vset.pattern.permute.xlu0 %v1109_v22 }
0x10f1   :  { %v849_v62 = vpop.permute.xlu1 %848  ;;  %v840_v63 = vpop.permute.xlu0 %839 }
0x10f2   :  { %v851_v0 = vmul.f32 %v849_v62, %v1343_v55  ;;  %v842_v58 = vmul.f32 %v840_v63, %v1336_v53 }
0x10f4   :  { %v844_v1 = vrot.slane %v842_v58, 6  ;;  %v853_v2 = vrot.slane %v851_v0, 6 }
0x10f6   :  { %v846_v3 = vadd.f32 %v844_v1, %v1398_v19 }
0x10f8   :  { %v855_v4 = vadd.f32 %v853_v2, %v846_v3 }
0x10fa   :  { %1059 = vtanh.f32 %v855_v4  ;;  %v954_v6 = vmul.f32 -1.442695, %v855_v4 }
0x10fc   :  { %1061 = vpow2.f32 %v954_v6 }
0x1100   :  { %v1060_v5 = vpop.eup %1059 }
0x1101   :  { %881 = vrot.lane.b32.xlu2 %v1060_v5, %s1106_s6 }
0x1102   :  { %v1062_v23 = vpop.eup %1061 }
0x1103   :  { %v859_v7 = vadd.f32 1.0, %v1062_v23 }
0x1105   :  { %1063 = vrcp.f32 %v859_v7  ;;  %v871_v53 = vand.u32 2147483648, %v859_v7  ;;  %vm865_vm11 = vweird.f32 %v859_v7  ;;  %v869_v11 = vand.u32 2147483647, %v859_v7 }
0x1107   :  { %v872_v12 = vor.u32 1.1754944e-38, %v871_v53  ;;  %vm870_vm13 = vcmp.eq.f32.partialorder %v869_v11, 8.507059e+37 }
0x110b   :  { %v1064_v22 = vpop.eup %1063 }
0x110c   :  { %v861_v8 = vmul.f32 %v1064_v22, %v859_v7  ;;  %vm866_vm10 = vweird.f32 %v1064_v22 }
0x110d   :  { %vm867_vm12 = vmor %vm865_vm11, %vm866_vm10 }
0x110e   :  { %v862_v9 = vsub.f32 1.0, %v861_v8 }
0x1110   :  { %v863_v55 = vmul.f32 %v1064_v22, %v862_v9 }
0x1112   :  { %v864_v10 = vadd.f32 %v1064_v22, %v863_v55 }
0x1114   :  { %v868_v19 = vsel %vm867_vm12, %v1064_v22, %v864_v10 }
0x1115   :  { %v873_v14 = vsel %vm870_vm13, %v872_v12, %v868_v19 }
0x1116   :  { %v879_v21 = vmul.f32 %v877_v16, %v873_v14 }
0x115b   :  { %v882_v13 = vpop.permute.xlu2 %881 }
0x115c   :  { %v884_v15 = vmul.f32 %v882_v13, %v873_v14 }
0x115e   :  { %886 = vrot.lane.b32.xlu1 %v884_v15, %s1107_s7 }
0x11d0   :  { %v887_v24 = vpop.permute.xlu1 %886 }
0x11d1   :  { %v889_v25 = vadd.f32 %v887_v24, %v879_v21 }
0x11d3   :  { %1065 = vtanh.f32 %v889_v25 }
0x11d9   :  { %v1066_v28 = vpop.eup %1065 }
0x11da   :  { %892 = vrot.lane.b32.xlu2 %v1066_v28, %s1108_s16 }
0x1234   :  { %v893_v29 = vpop.permute.xlu2 %892 }
0x1235   :  { %v895_v30 = vmul.f32 %v893_v29, %v873_v14 }
0x1237   :  { %v897_v31 = vsel %vm896_vm3, %v895_v30, -inf }
0x1238   :  { %898 = vmax.xlane.f32.xlu0 %v897_v31 }
0x12ab   :  { %v899_v32 = vpop.xlane.xlu0 %898 }
0x12ac   :  { %v900_v18 = vsub.f32 %v895_v30, %v899_v32 }
0x12ae   :  { %v901_v33 = vmul.f32 1.442695, %v900_v18 }
0x12b0   :  { %1067 = vpow2.f32 %v901_v33 }
0x12b6   :  { %v1068_v17 = vpop.eup %1067 }
0x12b7   :  { %904 = vrot.lane.b32.xlu1 %v1068_v17, %s1111_s10 }
0x1329   :  { %v905_v20 = vpop.permute.xlu1 %904 }
0x132a   :  { %v908_v34 = vsel %vm907_vm14, %v905_v20, 0.0 }
0x132b   :  { %909 = vadd.xlane.f32.xlu2 %v908_v34 }
0x139e   :  { %v910_v35 = vpop.xlane.xlu2 %909 }
0x139f   :  { %1069 = vlog2.f32 %v910_v35 }
0x13a5   :  { %v1070_v36 = vpop.eup %1069 }
0x13a6   :  { %v912_v37 = vmul.f32 0.6931472, %v1070_v36 }
0x13a8   :  { %v913_v38 = vsub.f32 %v900_v18, %v912_v37 }
0x13aa   :  { %915 = vrot.lane.b32.xlu1 %v913_v38, %s1111_s10 }
0x141c   :  { %v916_v39 = vpop.permute.xlu1 %915 }
0x141d   :  { %918 = vst.msk [vmem:[#allocation3 - $0x6] sm:$0xc0] %vm907_vm14, %v916_v39 }
0x141e   :  { %929 = dma.vmem_to_hbm [thread:$0]  %s925_s17, 32, %s927_s1, [#allocation4]  }
0x141f   :  { %1095 = dma.done.wait [#allocation4], 32  }
0x1420   :  { %1096 = vsyncadd [#allocation4], 4294967264 }
0x1421   :  { %934 = vsyncpa [#allocation4], 1 }

</bundles_post_ra>
